<compile_context>
chip_gen: v6e
topology: v6e:2x2x1
jax: 0.10.0
libtpu: 0.0.40
codegen_flags: <defaults>
</compile_context>

<pallas_src>
import functools

import jax
import jax.numpy as jnp
from jax.experimental import pallas as pl
from jax.experimental.pallas import tpu as pltpu


def _factor_predictor_kernel(ns_actual, needs_mask,
                             e_ref, wk_ref, wv_ref, q_ref, wmu_ref, bmu_ref,
                             wsig_ref, bsig_ref, mu_ref, sigma_ref,
                             h_acc, s_acc):
    """Fused FactorPredictor forward over one Ns tile.

    Refs:
      e_ref    : [T, H]   stock-embedding tile (grid axis 0 walks Ns tiles)
      wk_ref   : [1, K]   w_key   (row layout)
      wv_ref   : [1, K]   w_value (row layout)
      q_ref    : [1, H]   attention query vector
      wmu_ref  : [1, H]   mapping_layer_mu weight (torch Linear [1, H] layout)
      bmu_ref  : [1, 1]   mapping_layer_mu bias
      wsig_ref : [1, H]   mapping_layer_sigma weight
      bsig_ref : [1, 1]   mapping_layer_sigma bias
      mu_ref   : [K, 1]   output mean        (resident across the grid)
      sigma_ref: [K, 1]   output variance    (resident across the grid)
      h_acc    : [K, H]   VMEM scratch — unnormalized sum_n a[n,k] * e[n,:]
      s_acc    : [1, K]   VMEM scratch — per-head sum_n a[n,k]
    """
    t = pl.program_id(0)
    T = e_ref.shape[0]
    K = wk_ref.shape[1]

    @pl.when(t == 0)
    def _init():
        h_acc[...] = jnp.zeros_like(h_acc)
        s_acc[...] = jnp.zeros_like(s_acc)

    e = e_ref[...]                                              # [T, H]
    q = q_ref[...]                                              # [1, H]
    wk = wk_ref[...]                                            # [1, K]

    # Per-stock quantities: one pass over e, lane (H) reductions.
    dot_qe = jnp.sum(e * q, axis=-1, keepdims=True)             # [T, 1] = q . e_n
    e_norm = jnp.sqrt(jnp.sum(e * e, axis=-1, keepdims=True))   # [T, 1] = ||e_n||
    q_norm = jnp.sqrt(jnp.sum(q * q, axis=-1, keepdims=True))   # [1, 1] = ||q||

    # Attention scores in stock-major layout [T, K] (no transposes needed):
    #   <q, k_{k,n}> = wk_k * (q.e_n) ;  ||k_{k,n}|| = |wk_k| * ||e_n||
    num = dot_qe * wk                                           # [T, K]
    den = (q_norm * jnp.abs(wk)) * e_norm                       # [T, K]
    a = jnp.maximum(num / den, 0.0)                             # relu(cosine score)

    if needs_mask:
        # Zero out zero-padded rows of the last tile (their 0/0 scores are NaN).
        row = t * T + jax.lax.broadcasted_iota(jnp.int32, (T, 1), 0)
        a = jnp.where(row < ns_actual, a, 0.0)

    # Accumulate unnormalized per-head sums.  K=4 rows, so VPU broadcast + sublane
    # reduce beats a ~3%-occupancy MXU matmul and stays exact f32.
    rows = []
    for kk in range(K):                                         # static, K is tiny
        ak = a[:, kk:kk + 1]                                    # [T, 1]
        rows.append(jnp.sum(ak * e, axis=0, keepdims=True))     # [1, H]
    h_acc[...] += jnp.concatenate(rows, axis=0)                 # [K, H]
    s_acc[...] += jnp.sum(a, axis=0, keepdims=True)             # [1, K]

    @pl.when(t == pl.num_programs(0) - 1)
    def _finalize():
        h = h_acc[...]                                          # [K, H]
        # scale_k = w_value_k / max(sum_n a[n,k], 1e-6)   (attention norm + w_value fold)
        scale = wv_ref[...] / jnp.maximum(s_acc[...], 1e-6)     # [1, K]
        hs = []
        for kk in range(K):                                     # per-row rescale
            hs.append(h[kk:kk + 1, :] * scale[0:1, kk:kk + 1])  # [1, H]
        h_multi = jnp.concatenate(hs, axis=0)                   # [K, H]

        # Output heads: Linear(H -> 1) as elementwise-mul + lane reduction.
        mu = jnp.sum(h_multi * wmu_ref[...], axis=-1, keepdims=True) + bmu_ref[...]
        s = jnp.sum(h_multi * wsig_ref[...], axis=-1, keepdims=True) + bsig_ref[...]
        # Softplus with the PyTorch threshold-20 semantics.
        sigma = jnp.where(s > 20.0, s, jnp.log1p(jnp.exp(s)))

        mu_ref[...] = mu
        sigma_ref[...] = sigma


def factor_predictor(e, params, *, max_tile=2048):
    """e: [Ns, H] float32 -> (mu: [K], sigma: [K]) float32."""
    Ns, H = e.shape
    K = params["w_key"].shape[0]

    def round_up(x, m):
        return (x + m - 1) // m * m

    # Ns tiling: biggest tile up to max_tile rows (multiple of 8 sublanes); pad Ns to a
    # multiple of the tile and mask padded rows inside the kernel.
    T = min(round_up(Ns, 8), max_tile)
    padded = round_up(Ns, T)
    needs_mask = padded != Ns
    num_tiles = padded // T

    e = e.astype(jnp.float32)
    if needs_mask:
        e = jnp.pad(e, ((0, padded - Ns), (0, 0)))

    # Re-layout tiny parameters once on the host side (zero-cost, keeps the kernel
    # free of transposes): column vectors -> rows, biases -> [1, 1].
    wk = params["w_key"].reshape(1, K).astype(jnp.float32)
    wv = params["w_value"].reshape(1, K).astype(jnp.float32)
    qr = params["q"].reshape(1, H).astype(jnp.float32)
    wmu = params["w_mu"].reshape(1, H).astype(jnp.float32)
    bmu = params["b_mu"].reshape(1, 1).astype(jnp.float32)
    wsig = params["w_sigma"].reshape(1, H).astype(jnp.float32)
    bsig = params["b_sigma"].reshape(1, 1).astype(jnp.float32)

    kernel = functools.partial(_factor_predictor_kernel, Ns, needs_mask)

    mu, sigma = pl.pallas_call(
        kernel,
        out_shape=(jax.ShapeDtypeStruct((K, 1), jnp.float32),
                   jax.ShapeDtypeStruct((K, 1), jnp.float32)),
        grid_spec=pltpu.PrefetchScalarGridSpec(
            num_scalar_prefetch=0,
            grid=(num_tiles,),
            in_specs=[
                pl.BlockSpec((T, H), lambda i: (i, 0)),    # e (tiled over Ns)
                pl.BlockSpec((1, K), lambda i: (0, 0)),    # w_key
                pl.BlockSpec((1, K), lambda i: (0, 0)),    # w_value
                pl.BlockSpec((1, H), lambda i: (0, 0)),    # q
                pl.BlockSpec((1, H), lambda i: (0, 0)),    # w_mu
                pl.BlockSpec((1, 1), lambda i: (0, 0)),    # b_mu
                pl.BlockSpec((1, H), lambda i: (0, 0)),    # w_sigma
                pl.BlockSpec((1, 1), lambda i: (0, 0)),    # b_sigma
            ],
            out_specs=[
                pl.BlockSpec((K, 1), lambda i: (0, 0)),    # mu (resident)
                pl.BlockSpec((K, 1), lambda i: (0, 0)),    # sigma (resident)
            ],
            scratch_shapes=[
                pltpu.VMEM((K, H), jnp.float32),           # h_acc
                pltpu.VMEM((1, K), jnp.float32),           # s_acc
            ],
        ),
        compiler_params=pltpu.CompilerParams(
            dimension_semantics=("arbitrary",)),           # reduction axis
    )(e, wk, wv, qr, wmu, bmu, wsig, bsig)

    return mu[:, 0], sigma[:, 0]


def factor_predictor_ref(e, params):
    """Pure-JAX reference mirroring the PyTorch forward (for validation)."""
    w_key = params["w_key"]            # [K, 1]
    w_value = params["w_value"]        # [K, 1]
    q = params["q"]                    # [H]
    e1 = e[None, :, :]                 # [1, Ns, H]
    k = w_key[:, :, None] * e1         # einsum('kd,dnh->knh'), d == 1
    v = w_value[:, :, None] * e1
    q_norm = jnp.sqrt(jnp.sum(q * q))
    k_norm = jnp.sqrt(jnp.sum(k * k, axis=-1))                      # [K, Ns]
    a = jnp.sum(q[None, None, :] * k, axis=-1) / (q_norm * k_norm)  # [K, Ns]
    a = jnp.maximum(a, 0.0)
    a = a / jnp.maximum(jnp.sum(a, axis=-1, keepdims=True), 1e-6)
    h_multi = jnp.sum(a[:, :, None] * v, axis=1)                    # [K, H]
    mu = jnp.sum(h_multi * params["w_mu"], axis=-1) + params["b_mu"][0]
    s = jnp.sum(h_multi * params["w_sigma"], axis=-1) + params["b_sigma"][0]
    sigma = jnp.where(s > 20.0, s, jnp.log1p(jnp.exp(s)))
    return mu, sigma


def init_params(key, embedding_dim, K):
    """Deterministic synthetic init (randn for attention params, PyTorch-like Linear)."""
    H = embedding_dim
    ks = jax.random.split(key, 7)
    kb = 1.0 / jnp.sqrt(H)
    u = lambda k, shape: jax.random.uniform(k, shape, jnp.float32, -kb, kb)
    return {
        "w_key":   jax.random.normal(ks[0], (K, 1), jnp.float32),
        "w_value": jax.random.normal(ks[1], (K, 1), jnp.float32),
        "q":       jax.random.normal(ks[2], (H,), jnp.float32),
        "w_mu":    u(ks[3], (1, H)),     # torch Linear(H -> 1) weight layout
        "b_mu":    u(ks[4], (1,)),
        "w_sigma": u(ks[5], (1, H)),
        "b_sigma": u(ks[6], (1,)),
    }


if __name__ == "__main__":
    # Shapes consistent with the module defaults: H = embedding_dim = 128, K = 4 heads.
    H, K = 128, 4
    key = jax.random.PRNGKey(0)
    k_e1, k_e2, k_p = jax.random.split(key, 3)
    params = init_params(k_p, H, K)

    # Case 1: single-tile path (Ns = 256).
    e1 = jax.random.normal(k_e1, (256, H), jnp.float32)
    mu1, sig1 = jax.block_until_ready(factor_predictor(e1, params))
    mu1_ref, sig1_ref = factor_predictor_ref(e1, params)
    assert mu1.shape == (K,) and sig1.shape == (K,)
    assert jnp.allclose(mu1, mu1_ref, atol=1e-5, rtol=1e-4), "mu mismatch (single tile)"
    assert jnp.allclose(sig1, sig1_ref, atol=1e-5, rtol=1e-4), "sigma mismatch (single tile)"
    assert bool(jnp.all(sig1 > 0.0)), "softplus output must be positive"

    # Case 2: multi-tile + ragged-padding path (Ns = 300 with 128-row tiles).
    e2 = jax.random.normal(k_e2, (300, H), jnp.float32)
    mu2, sig2 = jax.block_until_ready(factor_predictor(e2, params, max_tile=128))
    mu2_ref, sig2_ref = factor_predictor_ref(e2, params)
    assert jnp.allclose(mu2, mu2_ref, atol=1e-5, rtol=1e-4), "mu mismatch (tiled/ragged)"
    assert jnp.allclose(sig2, sig2_ref, atol=1e-5, rtol=1e-4), "sigma mismatch (tiled/ragged)"
    assert bool(jnp.all(sig2 > 0.0)), "softplus output must be positive"

    print("KERNEL_OK")
</pallas_src>

<mosaic_0001>
module attributes {stable_mosaic.version = 11 : i64} {
  func.func @_factor_predictor_kernel(%arg0: i32, %arg1: memref<256x128xf32, #tpu.memory_space<vmem>>, %arg2: memref<1x4xf32, #tpu.memory_space<vmem>>, %arg3: memref<1x4xf32, #tpu.memory_space<vmem>>, %arg4: memref<1x128xf32, #tpu.memory_space<vmem>>, %arg5: memref<1x128xf32, #tpu.memory_space<vmem>>, %arg6: memref<1x1xf32, #tpu.memory_space<vmem>>, %arg7: memref<1x128xf32, #tpu.memory_space<vmem>>, %arg8: memref<1x1xf32, #tpu.memory_space<vmem>>, %arg9: memref<4x1xf32, #tpu.memory_space<vmem>>, %arg10: memref<4x1xf32, #tpu.memory_space<vmem>>, %arg11: memref<4x128xf32, #tpu.memory_space<vmem>>, %arg12: memref<1x4xf32, #tpu.memory_space<vmem>>) attributes {dimension_semantics = [#tpu.dimension_semantics<arbitrary>], iteration_bounds = array<i64: 1>, scalar_prefetch = 0 : i64, scratch_operands = 2 : i64, tpu.core_type = #tpu.core_type<tc>, window_params = [{transform_indices = @transform_0, window_bounds = array<i64: 256, 128>}, {pipeline_mode = #tpu.pipeline_mode<synchronous>, transform_indices = @transform_1, window_bounds = array<i64: 1, 4>}, {pipeline_mode = #tpu.pipeline_mode<synchronous>, transform_indices = @transform_2, window_bounds = array<i64: 1, 4>}, {pipeline_mode = #tpu.pipeline_mode<synchronous>, transform_indices = @transform_3, window_bounds = array<i64: 1, 128>}, {pipeline_mode = #tpu.pipeline_mode<synchronous>, transform_indices = @transform_4, window_bounds = array<i64: 1, 128>}, {pipeline_mode = #tpu.pipeline_mode<synchronous>, transform_indices = @transform_5, window_bounds = array<i64: 1, 1>}, {pipeline_mode = #tpu.pipeline_mode<synchronous>, transform_indices = @transform_6, window_bounds = array<i64: 1, 128>}, {pipeline_mode = #tpu.pipeline_mode<synchronous>, transform_indices = @transform_7, window_bounds = array<i64: 1, 1>}, {pipeline_mode = #tpu.pipeline_mode<synchronous>, transform_indices = @transform_8, window_bounds = array<i64: 4, 1>}, {pipeline_mode = #tpu.pipeline_mode<synchronous>, transform_indices = @transform_9, window_bounds = array<i64: 4, 1>}]} {
    %c0_i32 = arith.constant 0 : i32
    %0 = arith.cmpi eq, %arg0, %c0_i32 : i32
    %1 = arith.extui %0 : i1 to i32
    %c0_i32_0 = arith.constant 0 : i32
    %2 = arith.cmpi ne, %1, %c0_i32_0 : i32
    scf.if %2 {
      %cst_24 = arith.constant 0.000000e+00 : f32
      %62 = vector.broadcast %cst_24 : f32 to vector<4x128xf32>
      %c0_25 = arith.constant 0 : index
      %c0_26 = arith.constant 0 : index
      %63 = vector.load %arg11[%c0_25, %c0_26] : memref<4x128xf32, #tpu.memory_space<vmem>>, vector<4x128xf32>
      tpu.vector_store %arg11[%c0_25, %c0_26], %62 {strides = array<i32>} : memref<4x128xf32, #tpu.memory_space<vmem>>, vector<4x128xf32>,
      %cst_27 = arith.constant 0.000000e+00 : f32
      %64 = vector.broadcast %cst_27 : f32 to vector<1x4xf32>
      %c0_28 = arith.constant 0 : index
      %c0_29 = arith.constant 0 : index
      %65 = vector.load %arg12[%c0_28, %c0_29] : memref<1x4xf32, #tpu.memory_space<vmem>>, vector<1x4xf32>
      tpu.vector_store %arg12[%c0_28, %c0_29], %64 {strides = array<i32>} : memref<1x4xf32, #tpu.memory_space<vmem>>, vector<1x4xf32>,
    } else {
    }
    %c0 = arith.constant 0 : index
    %c0_1 = arith.constant 0 : index
    %3 = vector.load %arg1[%c0, %c0_1] : memref<256x128xf32, #tpu.memory_space<vmem>>, vector<256x128xf32>
    %c0_2 = arith.constant 0 : index
    %c0_3 = arith.constant 0 : index
    %4 = vector.load %arg4[%c0_2, %c0_3] : memref<1x128xf32, #tpu.memory_space<vmem>>, vector<1x128xf32>
    %c0_4 = arith.constant 0 : index
    %c0_5 = arith.constant 0 : index
    %5 = vector.load %arg2[%c0_4, %c0_5] : memref<1x4xf32, #tpu.memory_space<vmem>>, vector<1x4xf32>
    %6 = vector.broadcast %4 : vector<1x128xf32> to vector<256x128xf32>
    %7 = arith.mulf %3, %6 : vector<256x128xf32>
    %cst = arith.constant dense<0.000000e+00> : vector<256xf32>
    %8 = vector.multi_reduction <add>, %7, %cst [1] : vector<256x128xf32> to vector<256xf32>
    %9 = vector.shape_cast %8 : vector<256xf32> to vector<256x1xf32>
    %10 = arith.mulf %3, %3 : vector<256x128xf32>
    %cst_6 = arith.constant dense<0.000000e+00> : vector<256xf32>
    %11 = vector.multi_reduction <add>, %10, %cst_6 [1] : vector<256x128xf32> to vector<256xf32>
    %12 = vector.shape_cast %11 : vector<256xf32> to vector<256x1xf32>
    %13 = math.sqrt %12 : vector<256x1xf32>
    %14 = arith.mulf %4, %4 : vector<1x128xf32>
    %cst_7 = arith.constant dense<0.000000e+00> : vector<1xf32>
    %15 = vector.multi_reduction <add>, %14, %cst_7 [1] : vector<1x128xf32> to vector<1xf32>
    %16 = vector.shape_cast %15 : vector<1xf32> to vector<1x1xf32>
    %17 = math.sqrt %16 : vector<1x1xf32>
    %18 = vector.broadcast %9 : vector<256x1xf32> to vector<256x4xf32>
    %19 = vector.broadcast %5 : vector<1x4xf32> to vector<256x4xf32>
    %20 = arith.mulf %18, %19 : vector<256x4xf32>
    %21 = math.absf %5 : vector<1x4xf32>
    %22 = vector.broadcast %17 : vector<1x1xf32> to vector<1x4xf32>
    %23 = arith.mulf %22, %21 : vector<1x4xf32>
    %24 = vector.broadcast %23 : vector<1x4xf32> to vector<256x4xf32>
    %25 = vector.broadcast %13 : vector<256x1xf32> to vector<256x4xf32>
    %26 = arith.mulf %24, %25 : vector<256x4xf32>
    %27 = arith.divf %20, %26 : vector<256x4xf32>
    %cst_8 = arith.constant 0.000000e+00 : f32
    %28 = vector.broadcast %cst_8 : f32 to vector<256x4xf32>
    %29 = arith.maximumf %27, %28 : vector<256x4xf32>
    %30 = vector.extract_strided_slice %29 {offsets = [0, 0], sizes = [256, 1], strides = [1, 1]} : vector<256x4xf32> to vector<256x1xf32>
    %31 = vector.broadcast %30 : vector<256x1xf32> to vector<256x128xf32>
    %32 = arith.mulf %31, %3 : vector<256x128xf32>
    %cst_9 = arith.constant dense<0.000000e+00> : vector<128xf32>
    %33 = vector.multi_reduction <add>, %32, %cst_9 [0] : vector<256x128xf32> to vector<128xf32>
    %34 = vector.shape_cast %33 : vector<128xf32> to vector<1x128xf32>
    %35 = vector.extract_strided_slice %29 {offsets = [0, 1], sizes = [256, 1], strides = [1, 1]} : vector<256x4xf32> to vector<256x1xf32>
    %36 = vector.broadcast %35 : vector<256x1xf32> to vector<256x128xf32>
    %37 = arith.mulf %36, %3 : vector<256x128xf32>
    %cst_10 = arith.constant dense<0.000000e+00> : vector<128xf32>
    %38 = vector.multi_reduction <add>, %37, %cst_10 [0] : vector<256x128xf32> to vector<128xf32>
    %39 = vector.shape_cast %38 : vector<128xf32> to vector<1x128xf32>
    %40 = vector.extract_strided_slice %29 {offsets = [0, 2], sizes = [256, 1], strides = [1, 1]} : vector<256x4xf32> to vector<256x1xf32>
    %41 = vector.broadcast %40 : vector<256x1xf32> to vector<256x128xf32>
    %42 = arith.mulf %41, %3 : vector<256x128xf32>
    %cst_11 = arith.constant dense<0.000000e+00> : vector<128xf32>
    %43 = vector.multi_reduction <add>, %42, %cst_11 [0] : vector<256x128xf32> to vector<128xf32>
    %44 = vector.shape_cast %43 : vector<128xf32> to vector<1x128xf32>
    %45 = vector.extract_strided_slice %29 {offsets = [0, 3], sizes = [256, 1], strides = [1, 1]} : vector<256x4xf32> to vector<256x1xf32>
    %46 = vector.broadcast %45 : vector<256x1xf32> to vector<256x128xf32>
    %47 = arith.mulf %46, %3 : vector<256x128xf32>
    %cst_12 = arith.constant dense<0.000000e+00> : vector<128xf32>
    %48 = vector.multi_reduction <add>, %47, %cst_12 [0] : vector<256x128xf32> to vector<128xf32>
    %49 = vector.shape_cast %48 : vector<128xf32> to vector<1x128xf32>
    %c0_13 = arith.constant 0 : index
    %c0_14 = arith.constant 0 : index
    %50 = vector.load %arg11[%c0_13, %c0_14] : memref<4x128xf32, #tpu.memory_space<vmem>>, vector<4x128xf32>
    %51 = tpu.concatenate %34, %39, %44, %49 in 0 : vector<1x128xf32>, vector<1x128xf32>, vector<1x128xf32>, vector<1x128xf32> -> vector<4x128xf32>
    %52 = arith.addf %50, %51 : vector<4x128xf32>
    %c0_15 = arith.constant 0 : index
    %c0_16 = arith.constant 0 : index
    %53 = vector.load %arg11[%c0_15, %c0_16] : memref<4x128xf32, #tpu.memory_space<vmem>>, vector<4x128xf32>
    tpu.vector_store %arg11[%c0_15, %c0_16], %52 {strides = array<i32>} : memref<4x128xf32, #tpu.memory_space<vmem>>, vector<4x128xf32>,
    %c0_17 = arith.constant 0 : index
    %c0_18 = arith.constant 0 : index
    %54 = vector.load %arg12[%c0_17, %c0_18] : memref<1x4xf32, #tpu.memory_space<vmem>>, vector<1x4xf32>
    %cst_19 = arith.constant dense<0.000000e+00> : vector<4xf32>
    %55 = vector.multi_reduction <add>, %29, %cst_19 [0] : vector<256x4xf32> to vector<4xf32>
    %56 = vector.shape_cast %55 : vector<4xf32> to vector<1x4xf32>
    %57 = arith.addf %54, %56 : vector<1x4xf32>
    %c0_20 = arith.constant 0 : index
    %c0_21 = arith.constant 0 : index
    %58 = vector.load %arg12[%c0_20, %c0_21] : memref<1x4xf32, #tpu.memory_space<vmem>>, vector<1x4xf32>
    tpu.vector_store %arg12[%c0_20, %c0_21], %57 {strides = array<i32>} : memref<1x4xf32, #tpu.memory_space<vmem>>, vector<1x4xf32>,
    %c0_i32_22 = arith.constant 0 : i32
    %59 = arith.cmpi eq, %arg0, %c0_i32_22 : i32
    %60 = arith.extui %59 : i1 to i32
    %c0_i32_23 = arith.constant 0 : i32
    %61 = arith.cmpi ne, %60, %c0_i32_23 : i32
    scf.if %61 {
      %c0_24 = arith.constant 0 : index
      %c0_25 = arith.constant 0 : index
      %62 = vector.load %arg11[%c0_24, %c0_25] : memref<4x128xf32, #tpu.memory_space<vmem>>, vector<4x128xf32>
      %c0_26 = arith.constant 0 : index
      %c0_27 = arith.constant 0 : index
      %63 = vector.load %arg3[%c0_26, %c0_27] : memref<1x4xf32, #tpu.memory_space<vmem>>, vector<1x4xf32>
      %c0_28 = arith.constant 0 : index
      %c0_29 = arith.constant 0 : index
      %64 = vector.load %arg12[%c0_28, %c0_29] : memref<1x4xf32, #tpu.memory_space<vmem>>, vector<1x4xf32>
      %cst_30 = arith.constant 9.99999997E-7 : f32
      %65 = vector.broadcast %cst_30 : f32 to vector<1x4xf32>
      %66 = arith.maximumf %64, %65 : vector<1x4xf32>
      %67 = arith.divf %63, %66 : vector<1x4xf32>
      %68 = vector.extract_strided_slice %62 {offsets = [0, 0], sizes = [1, 128], strides = [1, 1]} : vector<4x128xf32> to vector<1x128xf32>
      %69 = vector.extract_strided_slice %67 {offsets = [0, 0], sizes = [1, 1], strides = [1, 1]} : vector<1x4xf32> to vector<1x1xf32>
      %70 = vector.broadcast %69 : vector<1x1xf32> to vector<1x128xf32>
      %71 = arith.mulf %68, %70 : vector<1x128xf32>
      %72 = vector.extract_strided_slice %62 {offsets = [1, 0], sizes = [1, 128], strides = [1, 1]} : vector<4x128xf32> to vector<1x128xf32>
      %73 = vector.extract_strided_slice %67 {offsets = [0, 1], sizes = [1, 1], strides = [1, 1]} : vector<1x4xf32> to vector<1x1xf32>
      %74 = vector.broadcast %73 : vector<1x1xf32> to vector<1x128xf32>
      %75 = arith.mulf %72, %74 : vector<1x128xf32>
      %76 = vector.extract_strided_slice %62 {offsets = [2, 0], sizes = [1, 128], strides = [1, 1]} : vector<4x128xf32> to vector<1x128xf32>
      %77 = vector.extract_strided_slice %67 {offsets = [0, 2], sizes = [1, 1], strides = [1, 1]} : vector<1x4xf32> to vector<1x1xf32>
      %78 = vector.broadcast %77 : vector<1x1xf32> to vector<1x128xf32>
      %79 = arith.mulf %76, %78 : vector<1x128xf32>
      %80 = vector.extract_strided_slice %62 {offsets = [3, 0], sizes = [1, 128], strides = [1, 1]} : vector<4x128xf32> to vector<1x128xf32>
      %81 = vector.extract_strided_slice %67 {offsets = [0, 3], sizes = [1, 1], strides = [1, 1]} : vector<1x4xf32> to vector<1x1xf32>
      %82 = vector.broadcast %81 : vector<1x1xf32> to vector<1x128xf32>
      %83 = arith.mulf %80, %82 : vector<1x128xf32>
      %84 = tpu.concatenate %71, %75, %79, %83 in 0 : vector<1x128xf32>, vector<1x128xf32>, vector<1x128xf32>, vector<1x128xf32> -> vector<4x128xf32>
      %c0_31 = arith.constant 0 : index
      %c0_32 = arith.constant 0 : index
      %85 = vector.load %arg5[%c0_31, %c0_32] : memref<1x128xf32, #tpu.memory_space<vmem>>, vector<1x128xf32>
      %86 = vector.broadcast %85 : vector<1x128xf32> to vector<4x128xf32>
      %87 = arith.mulf %84, %86 : vector<4x128xf32>
      %cst_33 = arith.constant dense<0.000000e+00> : vector<4xf32>
      %88 = vector.multi_reduction <add>, %87, %cst_33 [1] : vector<4x128xf32> to vector<4xf32>
      %89 = vector.shape_cast %88 : vector<4xf32> to vector<4x1xf32>
      %c0_34 = arith.constant 0 : index
      %c0_35 = arith.constant 0 : index
      %90 = vector.load %arg6[%c0_34, %c0_35] : memref<1x1xf32, #tpu.memory_space<vmem>>, vector<1x1xf32>
      %91 = vector.broadcast %90 : vector<1x1xf32> to vector<4x1xf32>
      %92 = arith.addf %89, %91 : vector<4x1xf32>
      %c0_36 = arith.constant 0 : index
      %c0_37 = arith.constant 0 : index
      %93 = vector.load %arg7[%c0_36, %c0_37] : memref<1x128xf32, #tpu.memory_space<vmem>>, vector<1x128xf32>
      %94 = vector.broadcast %93 : vector<1x128xf32> to vector<4x128xf32>
      %95 = arith.mulf %84, %94 : vector<4x128xf32>
      %cst_38 = arith.constant dense<0.000000e+00> : vector<4xf32>
      %96 = vector.multi_reduction <add>, %95, %cst_38 [1] : vector<4x128xf32> to vector<4xf32>
      %97 = vector.shape_cast %96 : vector<4xf32> to vector<4x1xf32>
      %c0_39 = arith.constant 0 : index
      %c0_40 = arith.constant 0 : index
      %98 = vector.load %arg8[%c0_39, %c0_40] : memref<1x1xf32, #tpu.memory_space<vmem>>, vector<1x1xf32>
      %99 = vector.broadcast %98 : vector<1x1xf32> to vector<4x1xf32>
      %100 = arith.addf %97, %99 : vector<4x1xf32>
      %cst_41 = arith.constant 2.000000e+01 : f32
      %101 = vector.broadcast %cst_41 : f32 to vector<4x1xf32>
      %102 = arith.cmpf ogt, %100, %101 : vector<4x1xf32>
      %103 = math.exp %100 : vector<4x1xf32>
      %104 = math.log1p %103 : vector<4x1xf32>
      %105 = arith.select %102, %100, %104 : vector<4x1xi1>, vector<4x1xf32>
      %c0_42 = arith.constant 0 : index
      %c0_43 = arith.constant 0 : index
      %106 = vector.load %arg9[%c0_42, %c0_43] : memref<4x1xf32, #tpu.memory_space<vmem>>, vector<4x1xf32>
      tpu.vector_store %arg9[%c0_42, %c0_43], %92 {strides = array<i32>} : memref<4x1xf32, #tpu.memory_space<vmem>>, vector<4x1xf32>,
      %c0_44 = arith.constant 0 : index
      %c0_45 = arith.constant 0 : index
      %107 = vector.load %arg10[%c0_44, %c0_45] : memref<4x1xf32, #tpu.memory_space<vmem>>, vector<4x1xf32>
      tpu.vector_store %arg10[%c0_44, %c0_45], %105 {strides = array<i32>} : memref<4x1xf32, #tpu.memory_space<vmem>>, vector<4x1xf32>,
    } else {
    }
    return
  }
  func.func @transform_0(%arg0: i32) -> (i32, i32) {
    %c0_i32 = arith.constant 0 : i32
    %c0_i32_0 = arith.constant 0 : i32
    return %arg0, %c0_i32 : i32, i32
  }
  func.func @transform_1(%arg0: i32) -> (i32, i32) {
    %c0_i32 = arith.constant 0 : i32
    %c0_i32_0 = arith.constant 0 : i32
    %c0_i32_1 = arith.constant 0 : i32
    return %c0_i32, %c0_i32_0 : i32, i32
  }
  func.func @transform_2(%arg0: i32) -> (i32, i32) {
    %c0_i32 = arith.constant 0 : i32
    %c0_i32_0 = arith.constant 0 : i32
    %c0_i32_1 = arith.constant 0 : i32
    return %c0_i32, %c0_i32_0 : i32, i32
  }
  func.func @transform_3(%arg0: i32) -> (i32, i32) {
    %c0_i32 = arith.constant 0 : i32
    %c0_i32_0 = arith.constant 0 : i32
    %c0_i32_1 = arith.constant 0 : i32
    return %c0_i32, %c0_i32_0 : i32, i32
  }
  func.func @transform_4(%arg0: i32) -> (i32, i32) {
    %c0_i32 = arith.constant 0 : i32
    %c0_i32_0 = arith.constant 0 : i32
    %c0_i32_1 = arith.constant 0 : i32
    return %c0_i32, %c0_i32_0 : i32, i32
  }
  func.func @transform_5(%arg0: i32) -> (i32, i32) {
    %c0_i32 = arith.constant 0 : i32
    %c0_i32_0 = arith.constant 0 : i32
    %c0_i32_1 = arith.constant 0 : i32
    return %c0_i32, %c0_i32_0 : i32, i32
  }
  func.func @transform_6(%arg0: i32) -> (i32, i32) {
    %c0_i32 = arith.constant 0 : i32
    %c0_i32_0 = arith.constant 0 : i32
    %c0_i32_1 = arith.constant 0 : i32
    return %c0_i32, %c0_i32_0 : i32, i32
  }
  func.func @transform_7(%arg0: i32) -> (i32, i32) {
    %c0_i32 = arith.constant 0 : i32
    %c0_i32_0 = arith.constant 0 : i32
    %c0_i32_1 = arith.constant 0 : i32
    return %c0_i32, %c0_i32_0 : i32, i32
  }
  func.func @transform_8(%arg0: i32) -> (i32, i32) {
    %c0_i32 = arith.constant 0 : i32
    %c0_i32_0 = arith.constant 0 : i32
    %c0_i32_1 = arith.constant 0 : i32
    return %c0_i32, %c0_i32_0 : i32, i32
  }
  func.func @transform_9(%arg0: i32) -> (i32, i32) {
    %c0_i32 = arith.constant 0 : i32
    %c0_i32_0 = arith.constant 0 : i32
    %c0_i32_1 = arith.constant 0 : i32
    return %c0_i32, %c0_i32_0 : i32, i32
  }
}

</mosaic_0001>

<bundles_post_ra>
// kernel: tpu_custom_call.1
= control target key start
LH: loop header
LB: loop body
LE: loop exit
PB: predicated region body
PF: predicated region fallthrough
CT: control target
= control target key end

     0   :  { %s3629_s0 = inlined_call_operand.hbm [shape: f32[256,128], index: 0, kind: input, shape index: {}]   ;;  %s3630_s1 = inlined_call_operand.vmem [shape: f32[1,4], index: 1, kind: input, shape index: {}]   ;;  %s3631_s2 = inlined_call_operand.vmem [shape: f32[1,4], index: 2, kind: input, shape index: {}]   ;;  %s3632_s3 = inlined_call_operand.vmem [shape: f32[1,128], index: 3, kind: input, shape index: {}]   ;;  %s3633_s4 = inlined_call_operand.vmem [shape: f32[1,128], index: 4, kind: input, shape index: {}]   ;;  %s3634_s5 = inlined_call_operand.<no memory space> [shape: f32[1,1], index: 5, kind: input, shape index: {}]   ;;  %s3635_s6 = inlined_call_operand.vmem [shape: f32[1,128], index: 6, kind: input, shape index: {}]   ;;  %s3636_s8 = inlined_call_operand.vmem [shape: f32[4,1], index: 8, kind: output, shape index: {0}]   ;;  %s3637_s9 = inlined_call_operand.vmem [shape: f32[4,1], index: 9, kind: output, shape index: {1}]   ;;  %s3638_s7 = inlined_call_operand.<no memory space> [shape: f32[1,1], index: 7, kind: input, shape index: {}]  }
   0x1   :  { %v15_v0 = vstv %s3634_s5  ;;  %v17_v1 = vstv %s3638_s7 }
   0x2   :  { %16 = vst [vmem:[#allocation4] sm:$0x1] %v15_v0  ;;  %18 = vst [vmem:[#allocation5] sm:$0x1] %v17_v1 }
   0x3   :  { %19 = vsyncpa [#allocation7], 0  ;;  %s1927_s13 = smov [#allocation6]  }
   0x4   :  { %s25_s14 = sshll.u32 %s1927_s13, 4  ;;  %s26_s14 = int_to_ptr.vmem [resolvable:$true] %s25_s14 }
   0x5   :  { %s1913_s15 = scalar_lea.vmem %s26_s14, 4096  ;;  %p1918_p1 = scmp.lt.s32.totalorder %s26_s14, %s26_s14 }
   0x6   :  { %p1914_p0 = scmp.ne.s32.totalorder %s26_s14, %s1913_s15  ;;  %p1919_p2 = scmp.lt.s32.totalorder %s1913_s15, %s1913_s15 }
   0x8   :  { %p1920_p3 = por %p1919_p2, %p1918_p1 }
   0xa   :  { %p1921_p4 = pnand %p1920_p3, %p1914_p0 }
   0xc   :  { %1924 = shalt.err (!%p1921_p4)
}
   0xd   :  { %s1928_s16 = smov 128   ;;  %s1929_s17 = smov 8  }
   0xe   :  { %31 = dma.hbm_to_vmem [thread:$0]  %s3629_s0, 4096, %s26_s14, [#allocation7], %s1928_s16, %s1928_s16, %s1929_s17  }
   0xf   :  { %1925 = dma.done.wait [#allocation7], 4096  }
  0x10   :  { %1926 = vsyncadd [#allocation7], 4294963200  ;;  %v91_v2 = vlaneseq  ;;  %v1996_v5 = vld [vmem:[#allocation6] sm:$0xff]  ;;  %v2001_v6 = vld [vmem:[%s3632_s3] sm:$0x1]  ;;  %vm3642_vm0 = vcmask 1040384  }
  0x11   :  { %v2007_v8 = vld [vmem:[#allocation6 + $0x10] sm:$0xff]  ;;  %v2009_v9 = vld [vmem:[#allocation6 + $0x8] sm:$0xff]  ;;  %v2011_v10 = vld [vmem:[#allocation6 + $0x18] sm:$0xff]  ;;  %vm3643_vm9 = vcmask 24576  }
  0x12   :  { %v92_v3 = vshrl.u32 %v91_v2, 7  ;;  %v2021_v15 = vld [vmem:[#allocation6 + $0x20] sm:$0xff]  ;;  %v2023_v16 = vld [vmem:[#allocation6 + $0x28] sm:$0xff]  ;;  %v2029_v19 = vld [vmem:[#allocation6 + $0x30] sm:$0xff] }
  0x13   :  { %v2031_v20 = vld [vmem:[#allocation6 + $0x38] sm:$0xff]  ;;  %v2037_v23 = vld [vmem:[#allocation6 + $0x40] sm:$0xff]  ;;  %v2039_v24 = vld [vmem:[#allocation6 + $0x48] sm:$0xff] }
  0x14   :  { %v1994_v4 = vsub.s32 0, %v92_v3  ;;  %v2045_v27 = vld [vmem:[#allocation6 + $0x50] sm:$0xff]  ;;  %v2047_v28 = vld [vmem:[#allocation6 + $0x58] sm:$0xff]  ;;  %v2053_v31 = vld [vmem:[#allocation6 + $0x60] sm:$0xff] }
  0x15   :  { %v2055_v32 = vld [vmem:[#allocation6 + $0x68] sm:$0xff]  ;;  %v2061_v35 = vld [vmem:[#allocation6 + $0x70] sm:$0xff]  ;;  %v2063_v36 = vld [vmem:[#allocation6 + $0x78] sm:$0xff] }
  0x16   :  { %3668 = vst [vmem:[#allocation9_spill] sm:$0xff] %v1994_v4  ;;  %v2005_v7 = vrot.slane %v2001_v6, %v1994_v4  ;;  %v2069_v39 = vld [vmem:[#allocation6 + $0x80] sm:$0xff]  ;;  %v2071_v40 = vld [vmem:[#allocation6 + $0x88] sm:$0xff]  ;;  %v2077_v43 = vld [vmem:[#allocation6 + $0x90] sm:$0xff] }
  0x17   :  { %v2079_v44 = vld [vmem:[#allocation6 + $0x98] sm:$0xff]  ;;  %v2085_v47 = vld [vmem:[#allocation6 + $0xa0] sm:$0xff]  ;;  %v2087_v48 = vld [vmem:[#allocation6 + $0xa8] sm:$0xff] }
  0x18   :  { %v96_v11 = vmul.f32 %v2005_v7, %v1996_v5  ;;  %v98_v12 = vmul.f32 %v2005_v7, %v2007_v8  ;;  %v97_v13 = vmul.f32 %v2005_v7, %v2009_v9  ;;  %v99_v14 = vmul.f32 %v2005_v7, %v2011_v10  ;;  %v2093_v51 = vld [vmem:[#allocation6 + $0xb0] sm:$0xff]  ;;  %v2095_v52 = vld [vmem:[#allocation6 + $0xb8] sm:$0xff]  ;;  %v2101_v55 = vld [vmem:[#allocation6 + $0xc0] sm:$0xff] }
  0x19   :  { %v100_v17 = vmul.f32 %v2005_v7, %v2021_v15  ;;  %v101_v18 = vmul.f32 %v2005_v7, %v2023_v16  ;;  %v102_v21 = vmul.f32 %v2005_v7, %v2029_v19  ;;  %v103_v22 = vmul.f32 %v2005_v7, %v2031_v20  ;;  %v2103_v56 = vld [vmem:[#allocation6 + $0xc8] sm:$0xff]  ;;  %v2109_v59 = vld [vmem:[#allocation6 + $0xd0] sm:$0xff]  ;;  %v2111_v60 = vld [vmem:[#allocation6 + $0xd8] sm:$0xff] }
  0x1a   :  { %128 = vadd.xlane.f32.xlu0 %v96_v11  ;;  %132 = vadd.xlane.f32.xlu1 %v98_v12  ;;  %v104_v25 = vmul.f32 %v2005_v7, %v2037_v23  ;;  %v105_v26 = vmul.f32 %v2005_v7, %v2039_v24  ;;  %v106_v29 = vmul.f32 %v2005_v7, %v2045_v27  ;;  %v2117_v63 = vld [vmem:[#allocation6 + $0xe0] sm:$0xff]  ;;  %v2119_v0 = vld [vmem:[#allocation6 + $0xe8] sm:$0xff]  ;;  %v2125_v3 = vld [vmem:[#allocation6 + $0xf0] sm:$0xff] }
  0x1b   :  { %v107_v30 = vmul.f32 %v2005_v7, %v2047_v28  ;;  %v108_v33 = vmul.f32 %v2005_v7, %v2053_v31  ;;  %v109_v34 = vmul.f32 %v2005_v7, %v2055_v32  ;;  %v110_v37 = vmul.f32 %v2005_v7, %v2061_v35  ;;  %v2127_v11 = vld [vmem:[#allocation6 + $0xf8] sm:$0xff] }
  0x1c   :  { %v111_v38 = vmul.f32 %v2005_v7, %v2063_v36  ;;  %v112_v41 = vmul.f32 %v2005_v7, %v2069_v39  ;;  %v113_v42 = vmul.f32 %v2005_v7, %v2071_v40  ;;  %v114_v45 = vmul.f32 %v2005_v7, %v2077_v43 }
  0x1d   :  { %v115_v46 = vmul.f32 %v2005_v7, %v2079_v44  ;;  %v116_v49 = vmul.f32 %v2005_v7, %v2085_v47  ;;  %v117_v50 = vmul.f32 %v2005_v7, %v2087_v48  ;;  %v118_v53 = vmul.f32 %v2005_v7, %v2093_v51 }
  0x1e   :  { %130 = vadd.xlane.f32.xlu0 %v97_v13  ;;  %134 = vadd.xlane.f32.xlu1 %v99_v14  ;;  %v119_v54 = vmul.f32 %v2005_v7, %v2095_v52  ;;  %v120_v57 = vmul.f32 %v2005_v7, %v2101_v55  ;;  %v121_v58 = vmul.f32 %v2005_v7, %v2103_v56 }
  0x1f   :  { %v122_v61 = vmul.f32 %v2005_v7, %v2109_v59  ;;  %v123_v62 = vmul.f32 %v2005_v7, %v2111_v60  ;;  %v124_v1 = vmul.f32 %v2005_v7, %v2117_v63  ;;  %v125_v2 = vmul.f32 %v2005_v7, %v2119_v0 }
  0x20   :  { %v126_v12 = vmul.f32 %v2005_v7, %v2125_v3  ;;  %v127_v13 = vmul.f32 %v2005_v7, %v2127_v11  ;;  %v192_v14 = vmul.f32 %v1996_v5, %v1996_v5  ;;  %v196_v7 = vmul.f32 %v2021_v15, %v2021_v15 }
  0x21   :  { %v197_v5 = vmul.f32 %v2023_v16, %v2023_v16  ;;  %v201_v15 = vmul.f32 %v2039_v24, %v2039_v24  ;;  %v202_v16 = vmul.f32 %v2045_v27, %v2045_v27  ;;  %v207_v24 = vmul.f32 %v2063_v36, %v2063_v36 }
  0x22   :  { %136 = vadd.xlane.f32.xlu0 %v100_v17  ;;  %138 = vadd.xlane.f32.xlu1 %v101_v18  ;;  %v193_v17 = vmul.f32 %v2009_v9, %v2009_v9  ;;  %v194_v18 = vmul.f32 %v2007_v8, %v2007_v8  ;;  %v198_v9 = vmul.f32 %v2029_v19, %v2029_v19 }
  0x23   :  { %v199_v8 = vmul.f32 %v2031_v20, %v2031_v20  ;;  %v203_v19 = vmul.f32 %v2047_v28, %v2047_v28  ;;  %v204_v20 = vmul.f32 %v2053_v31, %v2053_v31  ;;  %v210_v27 = vmul.f32 %v2077_v43, %v2077_v43 }
  0x24   :  { %v211_v28 = vmul.f32 %v2079_v44, %v2079_v44  ;;  %v214_v31 = vmul.f32 %v2093_v51, %v2093_v51  ;;  %v219_v36 = vmul.f32 %v2111_v60, %v2111_v60 }
  0x26   :  { %140 = vadd.xlane.f32.xlu0 %v102_v21  ;;  %142 = vadd.xlane.f32.xlu1 %v103_v22  ;;  %v195_v21 = vmul.f32 %v2011_v10, %v2011_v10  ;;  %v200_v10 = vmul.f32 %v2037_v23, %v2037_v23  ;;  %v205_v22 = vmul.f32 %v2055_v32, %v2055_v32 }
  0x27   :  { %v206_v23 = vmul.f32 %v2061_v35, %v2061_v35  ;;  %v215_v32 = vmul.f32 %v2095_v52, %v2095_v52  ;;  %v218_v35 = vmul.f32 %v2109_v59, %v2109_v59 }
  0x2a   :  { %144 = vadd.xlane.f32.xlu0 %v104_v25  ;;  %146 = vadd.xlane.f32.xlu1 %v105_v26  ;;  %v208_v25 = vmul.f32 %v2069_v39, %v2069_v39  ;;  %v209_v26 = vmul.f32 %v2071_v40, %v2071_v40  ;;  %v222_v39 = vmul.f32 %v2125_v3, %v2125_v3 }
  0x2b   :  { %v223_v40 = vmul.f32 %v2127_v11, %v2127_v11 }
  0x2e   :  { %148 = vadd.xlane.f32.xlu0 %v106_v29  ;;  %150 = vadd.xlane.f32.xlu1 %v107_v30  ;;  %v212_v29 = vmul.f32 %v2085_v47, %v2085_v47  ;;  %v213_v30 = vmul.f32 %v2087_v48, %v2087_v48 }
  0x32   :  { %152 = vadd.xlane.f32.xlu0 %v108_v33  ;;  %154 = vadd.xlane.f32.xlu1 %v109_v34  ;;  %v216_v33 = vmul.f32 %v2101_v55, %v2101_v55  ;;  %v217_v34 = vmul.f32 %v2103_v56, %v2103_v56 }
  0x36   :  { %156 = vadd.xlane.f32.xlu0 %v110_v37  ;;  %158 = vadd.xlane.f32.xlu1 %v111_v38  ;;  %v220_v37 = vmul.f32 %v2117_v63, %v2117_v63  ;;  %v221_v38 = vmul.f32 %v2119_v0, %v2119_v0 }
  0x3a   :  { %160 = vadd.xlane.f32.xlu0 %v112_v41  ;;  %162 = vadd.xlane.f32.xlu1 %v113_v42  ;;  %v512_v41 = vmul.f32 %v2001_v6, %v2001_v6 }
  0x3c   :  { %v514_v42 = vsel %vm3642_vm0, %v512_v41, 0.0 }
  0x3e   :  { %164 = vadd.xlane.f32.xlu0 %v114_v45  ;;  %166 = vadd.xlane.f32.xlu1 %v115_v46 }
  0x42   :  { %168 = vadd.xlane.f32.xlu0 %v116_v49  ;;  %170 = vadd.xlane.f32.xlu1 %v117_v50 }
  0x46   :  { %172 = vadd.xlane.f32.xlu0 %v118_v53  ;;  %174 = vadd.xlane.f32.xlu1 %v119_v54 }
  0x4a   :  { %176 = vadd.xlane.f32.xlu0 %v120_v57  ;;  %178 = vadd.xlane.f32.xlu1 %v121_v58 }
  0x4e   :  { %180 = vadd.xlane.f32.xlu0 %v122_v61  ;;  %182 = vadd.xlane.f32.xlu1 %v123_v62 }
  0x52   :  { %184 = vadd.xlane.f32.xlu0 %v124_v1  ;;  %186 = vadd.xlane.f32.xlu1 %v125_v2 }
  0x56   :  { %188 = vadd.xlane.f32.xlu0 %v126_v12  ;;  %190 = vadd.xlane.f32.xlu1 %v127_v13 }
  0x5a   :  { %224 = vadd.xlane.f32.xlu0 %v192_v14  ;;  %226 = vadd.xlane.f32.xlu1 %v193_v17 }
  0x5e   :  { %228 = vadd.xlane.f32.xlu0 %v194_v18  ;;  %230 = vadd.xlane.f32.xlu1 %v195_v21  ;;  %v3639_v21 = vmov 0  }
  0x5f   :  { %1724 = vset.pattern.permute.xlu0 %v3639_v21  ;;  %1723 = vset.pattern.permute.xlu1 %v3639_v21 }
  0x62   :  { %232 = vadd.xlane.f32.xlu0 %v196_v7  ;;  %234 = vadd.xlane.f32.xlu1 %v197_v5 }
  0x66   :  { %236 = vadd.xlane.f32.xlu0 %v198_v9  ;;  %238 = vadd.xlane.f32.xlu1 %v199_v8 }
  0x6a   :  { %240 = vadd.xlane.f32.xlu0 %v200_v10  ;;  %242 = vadd.xlane.f32.xlu1 %v201_v15 }
  0x6e   :  { %244 = vadd.xlane.f32.xlu0 %v202_v16  ;;  %246 = vadd.xlane.f32.xlu1 %v203_v19 }
  0x72   :  { %248 = vadd.xlane.f32.xlu0 %v204_v20  ;;  %250 = vadd.xlane.f32.xlu1 %v205_v22 }
  0x76   :  { %252 = vadd.xlane.f32.xlu0 %v206_v23  ;;  %254 = vadd.xlane.f32.xlu1 %v207_v24 }
  0x7a   :  { %256 = vadd.xlane.f32.xlu0 %v208_v25  ;;  %258 = vadd.xlane.f32.xlu1 %v209_v26 }
  0x7e   :  { %260 = vadd.xlane.f32.xlu0 %v210_v27  ;;  %262 = vadd.xlane.f32.xlu1 %v211_v28 }
  0x82   :  { %264 = vadd.xlane.f32.xlu0 %v212_v29  ;;  %266 = vadd.xlane.f32.xlu1 %v213_v30 }
  0x86   :  { %268 = vadd.xlane.f32.xlu0 %v214_v31  ;;  %270 = vadd.xlane.f32.xlu1 %v215_v32 }
  0x8a   :  { %272 = vadd.xlane.f32.xlu0 %v216_v33  ;;  %274 = vadd.xlane.f32.xlu1 %v217_v34 }
  0x8e   :  { %276 = vadd.xlane.f32.xlu0 %v218_v35  ;;  %278 = vadd.xlane.f32.xlu1 %v219_v36 }
  0x92   :  { %280 = vadd.xlane.f32.xlu0 %v220_v37  ;;  %282 = vadd.xlane.f32.xlu1 %v221_v38 }
  0x96   :  { %284 = vadd.xlane.f32.xlu0 %v222_v39  ;;  %286 = vadd.xlane.f32.xlu1 %v223_v40  ;;  %v2321_v39 = vld [vmem:[%s3630_s1] sm:$0x1] }
  0x97   :  { %v2330_v41 = vrot.slane %v2321_v39, %v1994_v4 }
  0x99   :  { %3681 = vst [vmem:[#allocation22_spill] sm:$0xff] %v2330_v41 }
  0x9a   :  { %515 = vadd.xlane.f32.xlu0 %v514_v42 }
  0xa3   :  { %v2200_v43 = vpop.xlane.xlu0 %128  ;;  %v2202_v44 = vpop.xlane.xlu1 %132 }
  0xa7   :  { %v2204_v45 = vpop.xlane.xlu0 %130  ;;  %v2206_v46 = vpop.xlane.xlu1 %134 }
  0xab   :  { %v2208_v47 = vpop.xlane.xlu0 %136  ;;  %v2210_v48 = vpop.xlane.xlu1 %138 }
  0xaf   :  { %v2212_v49 = vpop.xlane.xlu0 %140  ;;  %v2214_v6 = vpop.xlane.xlu1 %142 }
  0xb3   :  { %v2216_v50 = vpop.xlane.xlu0 %144  ;;  %v2218_v51 = vpop.xlane.xlu1 %146 }
  0xb7   :  { %v2220_v52 = vpop.xlane.xlu0 %148  ;;  %v2222_v53 = vpop.xlane.xlu1 %150 }
  0xbb   :  { %v2224_v54 = vpop.xlane.xlu0 %152  ;;  %v2226_v55 = vpop.xlane.xlu1 %154 }
  0xbf   :  { %v2228_v56 = vpop.xlane.xlu0 %156  ;;  %v2230_v57 = vpop.xlane.xlu1 %158 }
  0xc3   :  { %v2232_v58 = vpop.xlane.xlu0 %160  ;;  %v2234_v59 = vpop.xlane.xlu1 %162 }
  0xc4   :  { %3669 = vst [vmem:[#allocation10_spill] sm:$0xff] %v2234_v59 }
  0xc7   :  { %v2236_v60 = vpop.xlane.xlu0 %164  ;;  %v2238_v61 = vpop.xlane.xlu1 %166 }
  0xc8   :  { %3670 = vst [vmem:[#allocation11_spill] sm:$0xff] %v2238_v61 }
  0xcb   :  { %v2240_v62 = vpop.xlane.xlu0 %168  ;;  %v2242_v63 = vpop.xlane.xlu1 %170 }
  0xcc   :  { %3671 = vst [vmem:[#allocation12_spill] sm:$0xff] %v2242_v63  ;;  %v2421_v63 = vmul.f32 %v2330_v41, %v2240_v62 }
  0xce   :  { %3695 = vst [vmem:[#allocation36_spill] sm:$0xff] %v2421_v63 }
  0xcf   :  { %v2244_v0 = vpop.xlane.xlu0 %172  ;;  %v2246_v1 = vpop.xlane.xlu1 %174 }
  0xd0   :  { %3672 = vst [vmem:[#allocation13_spill] sm:$0xff] %v2244_v0  ;;  %3673 = vst [vmem:[#allocation14_spill] sm:$0xff] %v2246_v1  ;;  %v2376_v1 = vmul.f32 %v2330_v41, %v2216_v50  ;;  %v2395_v50 = vmul.f32 %v2330_v41, %v2222_v53 }
  0xd2   :  { %3685 = vst [vmem:[#allocation26_spill] sm:$0xff] %v2376_v1  ;;  %3689 = vst [vmem:[#allocation30_spill] sm:$0xff] %v2395_v50 }
  0xd3   :  { %v2248_v2 = vpop.xlane.xlu0 %176  ;;  %v2250_v3 = vpop.xlane.xlu1 %178 }
  0xd4   :  { %3674 = vst [vmem:[#allocation15_spill] sm:$0xff] %v2248_v2  ;;  %3675 = vst [vmem:[#allocation16_spill] sm:$0xff] %v2250_v3  ;;  %v2353_v3 = vmul.f32 %v2330_v41, %v2206_v46 }
  0xd7   :  { %v2252_v11 = vpop.xlane.xlu0 %180  ;;  %v2254_v12 = vpop.xlane.xlu1 %182 }
  0xd8   :  { %3676 = vst [vmem:[#allocation17_spill] sm:$0xff] %v2252_v11  ;;  %3677 = vst [vmem:[#allocation18_spill] sm:$0xff] %v2254_v12  ;;  %v2345_v12 = vmul.f32 %v2330_v41, %v2204_v45  ;;  %v2366_v45 = vmul.f32 %v2330_v41, %v2210_v48  ;;  %v2408_v11 = vmul.f32 %v2330_v41, %v2232_v58 }
  0xda   :  { %3683 = vst [vmem:[#allocation24_spill] sm:$0xff] %v2366_v45  ;;  %3692 = vst [vmem:[#allocation33_spill] sm:$0xff] %v2408_v11 }
  0xdb   :  { %v2256_v13 = vpop.xlane.xlu0 %184  ;;  %v2258_v14 = vpop.xlane.xlu1 %186 }
  0xdc   :  { %3678 = vst [vmem:[#allocation19_spill] sm:$0xff] %v2256_v13  ;;  %3679 = vst [vmem:[#allocation20_spill] sm:$0xff] %v2258_v14  ;;  %v2341_v14 = vmul.f32 %v2330_v41, %v2200_v43  ;;  %v2358_v13 = vmul.f32 %v2330_v41, %v2208_v47  ;;  %v2362_v43 = vmul.f32 %v2330_v41, %v2212_v49 }
  0xdd   :  { %v2380_v47 = vmul.f32 %v2330_v41, %v2220_v52  ;;  %v2384_v49 = vmul.f32 %v2330_v41, %v2218_v51  ;;  %v2399_v52 = vmul.f32 %v2330_v41, %v2226_v55  ;;  %v2404_v51 = vmul.f32 %v2330_v41, %v2228_v56 }
  0xde   :  { %3682 = vst [vmem:[#allocation23_spill] sm:$0xff] %v2362_v43  ;;  %v2417_v55 = vmul.f32 %v2330_v41, %v2236_v60 }
  0xdf   :  { %v2260_v17 = vpop.xlane.xlu0 %188  ;;  %v2262_v18 = vpop.xlane.xlu1 %190  ;;  %3686 = vst [vmem:[#allocation27_spill] sm:$0xff] %v2380_v47  ;;  %3687 = vst [vmem:[#allocation28_spill] sm:$0xff] %v2384_v49 }
  0xe0   :  { %3680 = vst [vmem:[#allocation21_spill] sm:$0xff] %v2260_v17  ;;  %v2349_v17 = vmul.f32 %v2330_v41, %v2202_v44  ;;  %v2370_v44 = vmul.f32 %v2330_v41, %v2214_v6  ;;  %v2391_v6 = vmul.f32 %v2330_v41, %v2224_v54  ;;  %3690 = vst [vmem:[#allocation31_spill] sm:$0xff] %v2399_v52 }
  0xe1   :  { %3691 = vst [vmem:[#allocation32_spill] sm:$0xff] %v2404_v51  ;;  %v2412_v54 = vmul.f32 %v2330_v41, %v2230_v57  ;;  %3694 = vst [vmem:[#allocation35_spill] sm:$0xff] %v2417_v55  ;;  %v2426_v56 = vmul.f32 %v2330_v41, %v2262_v18 }
  0xe2   :  { %3684 = vst [vmem:[#allocation25_spill] sm:$0xff] %v2370_v44  ;;  %3688 = vst [vmem:[#allocation29_spill] sm:$0xff] %v2391_v6 }
  0xe3   :  { %v2266_v7 = vpop.xlane.xlu0 %224  ;;  %v2268_v5 = vpop.xlane.xlu1 %226  ;;  %3693 = vst [vmem:[#allocation34_spill] sm:$0xff] %v2412_v54  ;;  %v1931_v54 = vmov 0.0  }
  0xe4   :  { %1737 = vrsqrt.f32 %v2266_v7  ;;  %vm290_vm1 = vcmp.eq.f32.partialorder %v2266_v7, inf  ;;  %v293_v57 = vand.u32 2147483648, %v2266_v7  ;;  %vm297_vm2 = vcmp.eq.f32.partialorder %v2268_v5, inf  ;;  %53 = vst [vmem:[#allocation2] sm:$0xf] %v1931_v54 }
  0xe5   :  { %1739 = vrsqrt.f32 %v2268_v5  ;;  %vm299_vm3 = vcmp.eq.f32.partialorder %v2268_v5, 0.0  ;;  %vm292_vm4 = vcmp.eq.f32.partialorder %v2266_v7, 0.0  ;;  %v300_v18 = vand.u32 2147483648, %v2268_v5  ;;  %55 = vst.msk [vmem:[#allocation3] sm:$0x1] %vm3643_vm9, %v1931_v54 }
  0xe7   :  { %v2270_v9 = vpop.xlane.xlu0 %228  ;;  %v2272_v8 = vpop.xlane.xlu1 %230 }
  0xe8   :  { %1741 = vrsqrt.f32 %v2270_v9  ;;  %vm304_vm5 = vcmp.eq.f32.partialorder %v2270_v9, inf  ;;  %v307_v62 = vand.u32 2147483648, %v2270_v9  ;;  %vm306_vm6 = vcmp.eq.f32.partialorder %v2270_v9, 0.0 }
  0xe9   :  { %1743 = vrsqrt.f32 %v2272_v8  ;;  %vm311_vm7 = vcmp.eq.f32.partialorder %v2272_v8, inf  ;;  %vm313_vm8 = vcmp.eq.f32.partialorder %v2272_v8, 0.0  ;;  %v314_v59 = vand.u32 2147483648, %v2272_v8 }
  0xeb   :  { %v2274_v10 = vpop.xlane.xlu0 %232  ;;  %v2276_v15 = vpop.xlane.xlu1 %234 }
  0xec   :  { %1745 = vrsqrt.f32 %v2274_v10  ;;  %vm318_vm10 = vcmp.eq.f32.partialorder %v2274_v10, inf  ;;  %vm320_vm11 = vcmp.eq.f32.partialorder %v2274_v10, 0.0  ;;  %vm325_vm12 = vcmp.eq.f32.partialorder %v2276_v15, inf }
  0xed   :  { %1747 = vrsqrt.f32 %v2276_v15  ;;  %vm327_vm13 = vcmp.eq.f32.partialorder %v2276_v15, 0.0 }
  0xef   :  { %v2278_v16 = vpop.xlane.xlu0 %236  ;;  %v2280_v19 = vpop.xlane.xlu1 %238 }
  0xf0   :  { %1749 = vrsqrt.f32 %v2278_v16  ;;  %vm332_vm14 = vcmp.eq.f32.partialorder %v2278_v16, inf  ;;  %vm334_vm15 = vcmp.eq.f32.partialorder %v2278_v16, 0.0  ;;  %vm341_vm9 = vcmp.eq.f32.partialorder %v2280_v19, 0.0 }
  0xf1   :  { %1751 = vrsqrt.f32 %v2280_v19  ;;  %v1738_v53 = vpop.eup %1737 }
  0xf2   :  { %v1740_v58 = vpop.eup %1739  ;;  %v289_v41 = vmul.f32 %v1738_v53, %v2266_v7  ;;  %v321_v53 = vand.u32 2147483648, %v2274_v10 }
  0xf3   :  { %v2282_v20 = vpop.xlane.xlu0 %240  ;;  %v2284_v22 = vpop.xlane.xlu1 %242  ;;  %v296_v52 = vmul.f32 %v1740_v58, %v2268_v5  ;;  %v335_v58 = vand.u32 2147483648, %v2278_v16 }
  0xf4   :  { %1753 = vrsqrt.f32 %v2282_v20  ;;  %v291_v54 = vsel %vm290_vm1, %v2266_v7, %v289_v41  ;;  %vm339_vm1 = vcmp.eq.f32.partialorder %v2280_v19, inf  ;;  %vm346_vm0 = vcmp.eq.f32.partialorder %v2282_v20, inf }
  0xf5   :  { %1755 = vrsqrt.f32 %v2284_v22  ;;  %v1742_v2 = vpop.eup %1741  ;;  %v298_v49 = vsel %vm297_vm2, %v2268_v5, %v296_v52  ;;  %v2485_v52 = vsel %vm292_vm4, %v293_v57, %v291_v54  ;;  %vm353_vm2 = vcmp.eq.f32.partialorder %v2284_v22, inf }
  0xf6   :  { %v1744_v0 = vpop.eup %1743  ;;  %v303_v55 = vmul.f32 %v1742_v2, %v2270_v9  ;;  %v2498_v45 = vsel %vm299_vm3, %v300_v18, %v298_v49  ;;  %v356_v7 = vand.u32 2147483648, %v2284_v22  ;;  %vm348_vm4 = vcmp.eq.f32.partialorder %v2282_v20, 0.0 }
  0xf7   :  { %v2286_v23 = vpop.xlane.xlu0 %244  ;;  %v2288_v24 = vpop.xlane.xlu1 %246  ;;  %v310_v50 = vmul.f32 %v1744_v0, %v2272_v8  ;;  %v328_v0 = vand.u32 2147483648, %v2276_v15 }
  0xf8   :  { %vm360_vm3 = vcmp.eq.f32.partialorder %v2286_v23, inf }
  0xf9   :  { %v1746_v63 = vpop.eup %1745  ;;  %v312_v41 = vsel %vm311_vm7, %v2272_v8, %v310_v50  ;;  %v349_v50 = vand.u32 2147483648, %v2282_v20  ;;  %vm369_vm7 = vcmp.eq.f32.partialorder %v2288_v24, 0.0 }
  0xfa   :  { %v1748_v11 = vpop.eup %1747  ;;  %v317_v51 = vmul.f32 %v1746_v63, %v2274_v10  ;;  %v305_v63 = vsel %vm304_vm5, %v2270_v9, %v303_v55  ;;  %v342_v55 = vand.u32 2147483648, %v2280_v19  ;;  %v363_v9 = vand.u32 2147483648, %v2286_v23 }
  0xfb   :  { %v2290_v25 = vpop.xlane.xlu0 %248  ;;  %v2292_v26 = vpop.xlane.xlu1 %250  ;;  %v324_v1 = vmul.f32 %v1748_v11, %v2276_v15  ;;  %v2494_v43 = vsel %vm306_vm6, %v307_v62, %v305_v63  ;;  %vm355_vm5 = vcmp.eq.f32.partialorder %v2284_v22, 0.0  ;;  %vm367_vm6 = vcmp.eq.f32.partialorder %v2288_v24, inf }
  0xfc   :  { %v319_v11 = vsel %vm318_vm10, %v2274_v10, %v317_v51  ;;  %v2504_v51 = vsel %vm313_vm8, %v314_v59, %v312_v41  ;;  %vm381_vm8 = vcmp.eq.f32.partialorder %v2292_v26, inf  ;;  %vm362_vm10 = vcmp.eq.f32.partialorder %v2286_v23, 0.0 }
  0xfd   :  { %v1750_v2 = vpop.eup %1749  ;;  %v326_v57 = vsel %vm325_vm12, %v2276_v15, %v324_v1  ;;  %v2515_v49 = vsel %vm320_vm11, %v321_v53, %v319_v11  ;;  %v370_v1 = vand.u32 2147483648, %v2288_v24  ;;  %v384_v53 = vand.u32 2147483648, %v2292_v26 }
  0xfe   :  { %v1752_v6 = vpop.eup %1751  ;;  %v331_v44 = vmul.f32 %v1750_v2, %v2278_v16  ;;  %v377_v2 = vand.u32 2147483648, %v2290_v25  ;;  %vm374_vm11 = vcmp.eq.f32.partialorder %v2290_v25, inf }
  0xff   :  { %v2294_v27 = vpop.xlane.xlu0 %252  ;;  %v2296_v28 = vpop.xlane.xlu1 %254  ;;  %v338_v59 = vmul.f32 %v1752_v6, %v2280_v19  ;;  %v2529_v6 = vsel %vm327_vm13, %v328_v0, %v326_v57 }
 0x100   :  { %v333_v62 = vsel %vm332_vm14, %v2278_v16, %v331_v44  ;;  %vm383_vm14 = vcmp.eq.f32.partialorder %v2292_v26, 0.0 }
 0x101   :  { %v1754_v47 = vpop.eup %1753  ;;  %v2543_v63 = vsel %vm334_vm15, %v335_v58, %v333_v62  ;;  %v340_v41 = vsel %vm339_vm1, %v2280_v19, %v338_v59  ;;  %vm376_vm15 = vcmp.eq.f32.partialorder %v2290_v25, 0.0  ;;  %v391_v62 = vand.u32 2147483648, %v2294_v27 }
 0x102   :  { %v1756_v5 = vpop.eup %1755  ;;  %v345_v18 = vmul.f32 %v1754_v47, %v2282_v20  ;;  %vm395_vm1 = vcmp.eq.f32.partialorder %v2296_v28, inf  ;;  %v398_v19 = vand.u32 2147483648, %v2296_v28 }
 0x103   :  { %v2298_v29 = vpop.xlane.xlu0 %256  ;;  %v2300_v30 = vpop.xlane.xlu1 %258  ;;  %v352_v47 = vmul.f32 %v1756_v5, %v2284_v22 }
 0x104   :  { %v347_v5 = vsel %vm346_vm0, %v2282_v20, %v345_v18  ;;  %v2564_v18 = vsel %vm341_vm9, %v342_v55, %v340_v41  ;;  %vm388_vm0 = vcmp.eq.f32.partialorder %v2294_v27, inf }
 0x107   :  { %v2302_v31 = vpop.xlane.xlu0 %260  ;;  %v2304_v32 = vpop.xlane.xlu1 %262 }
 0x10b   :  { %v2306_v33 = vpop.xlane.xlu0 %264  ;;  %v2308_v34 = vpop.xlane.xlu1 %266 }
 0x10f   :  { %v2310_v35 = vpop.xlane.xlu0 %268  ;;  %v2312_v36 = vpop.xlane.xlu1 %270 }
 0x113   :  { %v2314_v37 = vpop.xlane.xlu0 %272  ;;  %v2316_v38 = vpop.xlane.xlu1 %274 }
 0x117   :  { %v2326_v40 = vpop.xlane.xlu0 %276  ;;  %v2333_v42 = vpop.xlane.xlu1 %278 }
 0x11b   :  { %v2337_v21 = vpop.xlane.xlu0 %280  ;;  %v2372_v46 = vpop.xlane.xlu1 %282 }
 0x11f   :  { %v2386_v48 = vpop.xlane.xlu0 %284  ;;  %v2439_v61 = vpop.xlane.xlu1 %286 }
 0x120   :  { %vm507_vm9 = vcmp.eq.f32.partialorder %v2439_v61, inf }
 0x123   :  { %v2432_v60 = vpop.xlane.xlu0 %515 }
 0x124   :  { %1757 = vrsqrt.f32 %v2432_v60  ;;  %vm519_vm12 = vcmp.eq.f32.partialorder %v2432_v60, inf  ;;  %v522_v15 = vand.u32 2147483648, %v2432_v60  ;;  %vm521_vm13 = vcmp.eq.f32.partialorder %v2432_v60, 0.0 }
 0x125   :  { %1759 = vrsqrt.f32 %v2286_v23 }
 0x126   :  { %1761 = vrsqrt.f32 %v2288_v24 }
 0x127   :  { %1763 = vrsqrt.f32 %v2439_v61 }
 0x128   :  { %1765 = vrsqrt.f32 %v2290_v25 }
 0x129   :  { %1767 = vrsqrt.f32 %v2292_v26 }
 0x12a   :  { %1769 = vrsqrt.f32 %v2294_v27 }
 0x12b   :  { %1771 = vrsqrt.f32 %v2296_v28 }
 0x12c   :  { %1773 = vrsqrt.f32 %v2298_v29 }
 0x12d   :  { %1775 = vrsqrt.f32 %v2300_v30 }
 0x12e   :  { %1777 = vrsqrt.f32 %v2302_v31 }
 0x12f   :  { %1779 = vrsqrt.f32 %v2304_v32 }
 0x130   :  { %1781 = vrsqrt.f32 %v2306_v33 }
 0x131   :  { %v1758_v8 = vpop.eup %1757  ;;  %1783 = vrsqrt.f32 %v2308_v34 }
 0x132   :  { %v1760_v10 = vpop.eup %1759  ;;  %v518_v54 = vmul.f32 %v1758_v8, %v2432_v60  ;;  %1785 = vrsqrt.f32 %v2310_v35 }
 0x133   :  { %v1762_v44 = vpop.eup %1761  ;;  %v359_v8 = vmul.f32 %v1760_v10, %v2286_v23  ;;  %v354_v10 = vsel %vm353_vm2, %v2284_v22, %v352_v47  ;;  %vm390_vm2 = vcmp.eq.f32.partialorder %v2294_v27, 0.0  ;;  %1787 = vrsqrt.f32 %v2312_v36 }
 0x134   :  { %v1764_v0 = vpop.eup %1763  ;;  %v520_v11 = vsel %vm519_vm12, %v2432_v60, %v518_v54  ;;  %v366_v59 = vmul.f32 %v1762_v44, %v2288_v24  ;;  %v3696_v60 = vand.u32 2147483647, %v2321_v39  ;;  %v2590_v20 = vsel %vm355_vm5, %v356_v7, %v354_v10 }
 0x135   :  { %v1766_v57 = vpop.eup %1765  ;;  %v523_v16 = vsel %vm521_vm13, %v522_v15, %v520_v11  ;;  %v506_v44 = vmul.f32 %v1764_v0, %v2439_v61  ;;  %v2574_v15 = vsel %vm348_vm4, %v349_v50, %v347_v5  ;;  %v361_v47 = vsel %vm360_vm3, %v2286_v23, %v359_v8 }
 0x136   :  { %v1768_v58 = vpop.eup %1767  ;;  %v563_v54 = vmul.f32 %v3696_v60, %v523_v16  ;;  %v373_v39 = vmul.f32 %v1766_v57, %v2290_v25  ;;  %v405_v0 = vand.u32 2147483648, %v2298_v29  ;;  %v368_v50 = vsel %vm367_vm6, %v2288_v24, %v366_v59 }
 0x137   :  { %v1770_v55 = vpop.eup %1769  ;;  %v380_v41 = vmul.f32 %v1768_v58, %v2292_v26  ;;  %v510_v57 = vand.u32 2147483648, %v2439_v61  ;;  %vm397_vm4 = vcmp.eq.f32.partialorder %v2296_v28, 0.0  ;;  %v412_v5 = vand.u32 2147483648, %v2300_v30 }
 0x138   :  { %v2596_v11 = vrot.slane %v563_v54, %v1994_v4  ;;  %v508_v22 = vsel %vm507_vm9, %v2439_v61, %v506_v44  ;;  %vm509_vm5 = vcmp.eq.f32.partialorder %v2439_v61, 0.0  ;;  %v1772_v7 = vpop.eup %1771  ;;  %v2609_v8 = vsel %vm362_vm10, %v363_v9, %v361_v47 }
 0x139   :  { %v375_v16 = vsel %vm374_vm11, %v2290_v25, %v373_v39  ;;  %v387_v58 = vmul.f32 %v1770_v55, %v2294_v27  ;;  %vm402_vm3 = vcmp.eq.f32.partialorder %v2298_v29, inf  ;;  %vm409_vm6 = vcmp.eq.f32.partialorder %v2300_v30, inf  ;;  %v1774_v60 = vpop.eup %1773 }
 0x13a   :  { %v2622_v59 = vsel %vm369_vm7, %v370_v1, %v368_v50  ;;  %v382_v23 = vsel %vm381_vm8, %v2292_v26, %v380_v41  ;;  %v419_v9 = vand.u32 2147483648, %v2302_v31  ;;  %1789 = vrsqrt.f32 %v2314_v37  ;;  %v1776_v61 = vpop.eup %1775 }
 0x13b   :  { %v426_v54 = vand.u32 2147483648, %v2304_v32  ;;  %1791 = vrsqrt.f32 %v2316_v38  ;;  %v568_v10 = vmul.f32 %v2596_v11, %v2485_v52  ;;  %v511_v24 = vsel %vm509_vm5, %v510_v57, %v508_v22  ;;  %v1778_v50 = vpop.eup %1777 }
 0x13c   :  { %v2639_v1 = vsel %vm376_vm15, %v377_v2, %v375_v16  ;;  %vm404_vm7 = vcmp.eq.f32.partialorder %v2298_v29, 0.0  ;;  %v394_v44 = vmul.f32 %v1772_v7, %v2296_v28  ;;  %vm411_vm8 = vcmp.eq.f32.partialorder %v2300_v30, 0.0 }
 0x13d   :  { %v433_v39 = vand.u32 2147483648, %v2306_v33  ;;  %vm423_vm10 = vcmp.eq.f32.partialorder %v2304_v32, inf  ;;  %1793 = vrsqrt.f32 %v2326_v40  ;;  %v389_v52 = vsel %vm388_vm0, %v2294_v27, %v387_v58 }
 0x13e   :  { %v2654_v25 = vsel %vm383_vm14, %v384_v53, %v382_v23  ;;  %vm416_vm11 = vcmp.eq.f32.partialorder %v2302_v31, inf  ;;  %1795 = vrsqrt.f32 %v2333_v42  ;;  %v569_v2 = vmul.f32 %v2596_v11, %v2498_v45  ;;  %v1780_v53 = vpop.eup %1779 }
 0x13f   :  { %v401_v55 = vmul.f32 %v1774_v60, %v2298_v29  ;;  %1797 = vrsqrt.f32 %v2337_v21  ;;  %v570_v47 = vmul.f32 %v2596_v11, %v2494_v43  ;;  %v599_v41 = vmul.f32 %v2596_v11, %v511_v24  ;;  %v1782_v7 = vpop.eup %1781 }
 0x140   :  { %vm430_vm12 = vcmp.eq.f32.partialorder %v2306_v33, inf  ;;  %vm425_vm13 = vcmp.eq.f32.partialorder %v2304_v32, 0.0  ;;  %vm437_vm14 = vcmp.eq.f32.partialorder %v2308_v34, inf  ;;  %v440_v26 = vand.u32 2147483648, %v2308_v34 }
 0x141   :  { %v571_v45 = vmul.f32 %v2596_v11, %v2504_v51  ;;  %1799 = vrcp.f32 %v568_v10  ;;  %v396_v43 = vsel %vm395_vm1, %v2296_v28, %v394_v44  ;;  %vm418_vm15 = vcmp.eq.f32.partialorder %v2302_v31, 0.0 }
 0x142   :  { %v408_v57 = vmul.f32 %v1776_v61, %v2300_v30  ;;  %v572_v22 = vmul.f32 %v2596_v11, %v2515_v49  ;;  %1801 = vrcp.f32 %v599_v41  ;;  %v392_v51 = vsel %vm390_vm2, %v391_v62, %v389_v52  ;;  %v1784_v49 = vpop.eup %1783 }
 0x143   :  { %v447_v16 = vand.u32 2147483648, %v2310_v35  ;;  %v573_v58 = vmul.f32 %v2596_v11, %v2529_v6  ;;  %1803 = vrcp.f32 %v569_v2  ;;  %v403_v23 = vsel %vm402_vm3, %v2298_v29, %v401_v55 }
 0x144   :  { %v415_v60 = vmul.f32 %v1778_v50, %v2302_v31  ;;  %vm432_vm0 = vcmp.eq.f32.partialorder %v2306_v33, 0.0  ;;  %vm439_vm1 = vcmp.eq.f32.partialorder %v2308_v34, 0.0  ;;  %v574_v27 = vmul.f32 %v2596_v11, %v2543_v63 }
 0x145   :  { %1805 = vrcp.f32 %v570_v47  ;;  %v2697_v6 = vsel %vm397_vm4, %v398_v19, %v396_v43  ;;  %v422_v62 = vmul.f32 %v1780_v53, %v2304_v32  ;;  %vm444_vm9 = vcmp.eq.f32.partialorder %v2310_v35, inf  ;;  %v1786_v19 = vpop.eup %1785 }
 0x146   :  { %v454_v10 = vand.u32 2147483648, %v2312_v36  ;;  %1807 = vrcp.f32 %v571_v45  ;;  %v410_v24 = vsel %vm409_vm6, %v2300_v30, %v408_v57  ;;  %v429_v63 = vmul.f32 %v1782_v7, %v2306_v33  ;;  %v1788_v2 = vpop.eup %1787 }
 0x147   :  { %vm451_vm2 = vcmp.eq.f32.partialorder %v2312_v36, inf  ;;  %v575_v28 = vmul.f32 %v2596_v11, %v2564_v18  ;;  %1809 = vrcp.f32 %v572_v22  ;;  %v406_v44 = vsel %vm404_vm7, %v405_v0, %v403_v23  ;;  %v1790_v29 = vpop.eup %1789 }
 0x148   :  { %v461_v61 = vand.u32 2147483648, %v2314_v37  ;;  %v576_v52 = vmul.f32 %v2596_v11, %v2574_v15  ;;  %1811 = vrcp.f32 %v573_v58  ;;  %v417_v55 = vsel %vm416_vm11, %v2302_v31, %v415_v60  ;;  %v1792_v50 = vpop.eup %1791 }
 0x149   :  { %vm446_vm4 = vcmp.eq.f32.partialorder %v2310_v35, 0.0  ;;  %v436_v18 = vmul.f32 %v1784_v49, %v2308_v34  ;;  %v578_v47 = vmul.f32 %v2596_v11, %v2609_v8  ;;  %1813 = vrcp.f32 %v574_v27 }
 0x14a   :  { %vm1525_vm5 = vcmask 31744   ;;  %v2727_v15 = vsel %vm411_vm8, %v412_v5, %v410_v24  ;;  %v424_v0 = vsel %vm423_vm10, %v2304_v32, %v422_v62  ;;  %1815 = vrsqrt.f32 %v2372_v46  ;;  %v1794_v5 = vpop.eup %1793 }
 0x14b   :  { %v577_v41 = vmul.f32 %v2596_v11, %v2590_v20  ;;  %v431_v8 = vsel %vm430_vm12, %v2306_v33, %v429_v63  ;;  %v443_v45 = vmul.f32 %v1786_v19, %v2310_v35  ;;  %vm458_vm3 = vcmp.eq.f32.partialorder %v2314_v37, inf  ;;  %v2749_v57 = vpop.eup %1795 }
 0x14c   :  { %v580_v30 = vmul.f32 %v2596_v11, %v2639_v1  ;;  %1817 = vrcp.f32 %v575_v28  ;;  %v420_v53 = vsel %vm418_vm15, %v419_v9, %v417_v55  ;;  %vm453_vm6 = vcmp.eq.f32.partialorder %v2312_v36, 0.0  ;;  %v2761_v22 = vpop.eup %1797 }
 0x14d   :  { %v475_v20 = vand.u32 2147483648, %v2326_v40  ;;  %v468_v43 = vand.u32 2147483648, %v2316_v38  ;;  %1819 = vrcp.f32 %v576_v52  ;;  %v2755_v1 = vsel %vm425_vm13, %v426_v54, %v424_v0 }
 0x14e   :  { %v438_v31 = vsel %vm437_vm14, %v2308_v34, %v436_v18  ;;  %v582_v9 = vmul.f32 %v2596_v11, %v392_v51  ;;  %1821 = vrcp.f32 %v578_v47  ;;  %v434_v7 = vsel %vm432_vm0, %v433_v39, %v431_v8  ;;  %v1800_v54 = vpop.eup %1799 }
 0x14f   :  { %v450_v58 = vmul.f32 %v1788_v2, %v2312_v36  ;;  %vm465_vm7 = vcmp.eq.f32.partialorder %v2316_v38, inf  ;;  %v482_v32 = vand.u32 2147483648, %v2333_v42  ;;  %1823 = vrcp.f32 %v577_v41  ;;  %v1802_v33 = vpop.eup %1801 }
 0x150   :  { %v445_v51 = vsel %vm444_vm9, %v2310_v35, %v443_v45  ;;  %v489_v23 = vand.u32 2147483648, %v2337_v21  ;;  %v579_v60 = vmul.f32 %v2596_v11, %v2622_v59  ;;  %1825 = vrcp.f32 %v580_v30  ;;  %v1804_v62 = vpop.eup %1803 }
 0x151   :  { %v2780_v39 = vsel %vm439_vm1, %v440_v26, %v438_v31  ;;  %v457_v27 = vmul.f32 %v1790_v29, %v2314_v37  ;;  %vm460_vm8 = vcmp.eq.f32.partialorder %v2314_v37, 0.0  ;;  %1827 = vrsqrt.f32 %v2386_v48 }
 0x152   :  { %v601_v49 = vmul.f32 %v1800_v54, %v2341_v14  ;;  %vm472_vm10 = vcmp.eq.f32.partialorder %v2326_v40, inf  ;;  %v496_v59 = vand.u32 2147483648, %v2372_v46  ;;  %v584_v24 = vmul.f32 %v2596_v11, %v406_v44  ;;  %v1806_v26 = vpop.eup %1805  ;;  %v3698_v54 = vld [vmem:[#allocation23_spill] sm:$0xff] }
 0x153   :  { %1829 = vrcp.f32 %v582_v9  ;;  %v2790_v34 = vmul.f32 %v1802_v33, %v2426_v56  ;;  %v448_v63 = vsel %vm446_vm4, %v447_v16, %v445_v51  ;;  %v452_v14 = vsel %vm451_vm2, %v2312_v36, %v450_v58  ;;  %v1808_v52 = vpop.eup %1807 }
 0x154   :  { %v603_v28 = vmul.f32 %v1804_v62, %v2345_v12  ;;  %v2800_v19 = vmax.f32 %v601_v49, 0.0  ;;  %v464_v44 = vmul.f32 %v1792_v50, %v2316_v38  ;;  %vm467_vm11 = vcmp.eq.f32.partialorder %v2316_v38, 0.0  ;;  %v1810_v16 = vpop.eup %1809  ;;  %v3699_v62 = vld [vmem:[#allocation27_spill] sm:$0xff] }
 0x155   :  { %v581_v56 = vmul.f32 %v2596_v11, %v2654_v25  ;;  %1831 = vrcp.f32 %v579_v60  ;;  %v605_v35 = vmul.f32 %v1806_v26, %v2349_v17  ;;  %v459_v2 = vsel %vm458_vm3, %v2314_v37, %v457_v27  ;;  %v1812_v47 = vpop.eup %1811 }
 0x156   :  { %v2810_v55 = vmax.f32 %v603_v28, 0.0  ;;  %698 = vperm.xlu1 %1723, %v2800_v19   ;;  %v1526_v12 = vsel %vm1525_vm5, %v2800_v19, 0.0  ;;  %v607_v18 = vmul.f32 %v1808_v52, %v2353_v3  ;;  %v586_v25 = vmul.f32 %v2596_v11, %v420_v53  ;;  %v1814_v0 = vpop.eup %1813  ;;  %v3700_v28 = vld [vmem:[#allocation25_spill] sm:$0xff] }
 0x157   :  { %1833 = vrcp.f32 %v584_v24  ;;  %v2817_v29 = vmax.f32 %v605_v35, 0.0  ;;  %v609_v17 = vmul.f32 %v1810_v16, %v2358_v13  ;;  %v471_v41 = vmul.f32 %v1794_v5, %v2326_v40  ;;  %v2828_v45 = vpop.eup %1815 }
 0x158   :  { %v583_v50 = vmul.f32 %v2596_v11, %v2697_v6  ;;  %703 = vperm.xlu0 %1724, %v2810_v55   ;;  %v1527_v8 = vsel %vm1525_vm5, %v2810_v55, 0.0  ;;  %v2826_v3 = vmax.f32 %v607_v18, 0.0  ;;  %v2834_v13 = vsel %vm453_vm6, %v454_v10, %v452_v14  ;;  %v3697_v6 = vld [vmem:[#allocation24_spill] sm:$0xff] }
 0x159   :  { %vm474_vm12 = vcmp.eq.f32.partialorder %v2326_v40, 0.0  ;;  %1835 = vrcp.f32 %v581_v56  ;;  %v1528_v30 = vadd.f32 %v1527_v8, %v1526_v12  ;;  %v611_v5 = vmul.f32 %v1812_v47, %v3697_v6  ;;  %v1818_v53 = vpop.eup %1817  ;;  %v3701_v12 = vld [vmem:[#allocation29_spill] sm:$0xff]  ;;  %v3702_v47 = vld [vmem:[#allocation26_spill] sm:$0xff] }
 0x15a   :  { %v588_v31 = vmul.f32 %v2596_v11, %v434_v7  ;;  %v1529_v9 = vsel %vm1525_vm5, %v2817_v29, 0.0  ;;  %708 = vperm.xlu1 %1723, %v2817_v29   ;;  %v2842_v58 = vmax.f32 %v609_v17, 0.0  ;;  %v613_v36 = vmul.f32 %v1814_v0, %v3698_v54  ;;  %v1820_v10 = vpop.eup %1819 }
 0x15b   :  { %v462_v51 = vsel %vm460_vm8, %v461_v61, %v459_v2  ;;  %v466_v60 = vsel %vm465_vm7, %v2316_v38, %v464_v44  ;;  %vm486_vm13 = vcmp.eq.f32.partialorder %v2337_v21, inf  ;;  %vm479_vm14 = vcmp.eq.f32.partialorder %v2333_v42, inf  ;;  %v1822_v33 = vpop.eup %1821 }
 0x15c   :  { %1837 = vrcp.f32 %v586_v25  ;;  %v1530_v7 = vadd.f32 %v1529_v9, %v1528_v30  ;;  %v473_v27 = vsel %vm472_vm10, %v2326_v40, %v471_v41  ;;  %v585_v49 = vmul.f32 %v2596_v11, %v2727_v15  ;;  %v1824_v61 = vpop.eup %1823 }
 0x15d   :  { %1839 = vrcp.f32 %v583_v50  ;;  %v1531_v37 = vsel %vm1525_vm5, %v2826_v3, 0.0  ;;  %v621_v24 = vmul.f32 %v1822_v33, %v3699_v62  ;;  %v2862_v14 = vmax.f32 %v611_v5, 0.0  ;;  %v1826_v44 = vpop.eup %1825 }
 0x15e   :  { %v1532_v26 = vadd.f32 %v1531_v37, %v1530_v7  ;;  %v615_v52 = vmul.f32 %v1818_v53, %v3700_v28  ;;  %v590_v56 = vmul.f32 %v2596_v11, %v448_v63  ;;  %1841 = vrcp.f32 %v588_v31  ;;  %713 = vperm.xlu1 %1723, %v2826_v3   ;;  %v1828_v16 = vpop.eup %1827  ;;  %v3704_v31 = vld [vmem:[#allocation32_spill] sm:$0xff]  ;;  %v3706_v28 = vld [vmem:[#allocation33_spill] sm:$0xff] }
 0x15f   :  { %v1533_v15 = vsel %vm1525_vm5, %v2842_v58, 0.0  ;;  %v2869_v35 = vmax.f32 %v613_v36, 0.0  ;;  %vm488_vm15 = vcmp.eq.f32.partialorder %v2337_v21, 0.0  ;;  %vm481_vm0 = vcmp.eq.f32.partialorder %v2333_v42, 0.0 }
 0x160   :  { %vm500_vm1 = vcmp.eq.f32.partialorder %v2386_v48, inf  ;;  %v2874_v2 = vmax.f32 %v621_v24, 0.0  ;;  %v625_v18 = vmul.f32 %v1826_v44, %v3701_v12  ;;  %v1534_v63 = vadd.f32 %v1533_v15, %v1532_v26  ;;  %v1830_v17 = vpop.eup %1829 }
 0x161   :  { %v617_v25 = vmul.f32 %v1820_v10, %v3702_v47  ;;  %v2882_v0 = vsel %vm467_vm11, %v468_v43, %v466_v60  ;;  %v485_v41 = vmul.f32 %v2761_v22, %v2337_v21  ;;  %v478_v50 = vmul.f32 %v2749_v57, %v2333_v42  ;;  %v3703_v43 = vld [vmem:[#allocation28_spill] sm:$0xff] }
 0x162   :  { %v587_v8 = vmul.f32 %v2596_v11, %v2755_v1  ;;  %vm493_vm9 = vcmp.eq.f32.partialorder %v2372_v46, inf  ;;  %1843 = vrcp.f32 %v585_v49  ;;  %748 = vperm.xlu0 %1724, %v2874_v2   ;;  %v1535_v30 = vsel %vm1525_vm5, %v2862_v14, 0.0  ;;  %v1832_v5 = vpop.eup %1831  ;;  %718 = vperm.xlu1 %1723, %v2842_v58  }
 0x163   :  { %v2894_v38 = vmax.f32 %v615_v52, 0.0  ;;  %v619_v6 = vmul.f32 %v1824_v61, %v3703_v43  ;;  %v476_v57 = vsel %vm474_vm12, %v475_v20, %v473_v27  ;;  %v592_v1 = vmul.f32 %v2596_v11, %v462_v51  ;;  %v3705_v27 = vld [vmem:[#allocation30_spill] sm:$0xff]  ;;  %v3708_v43 = vld [vmem:[#allocation35_spill] sm:$0xff] }
 0x164   :  { %1845 = vrcp.f32 %v590_v56  ;;  %v1536_v22 = vadd.f32 %v1535_v30, %v1534_v63  ;;  %vm502_vm2 = vcmp.eq.f32.partialorder %v2386_v48, 0.0  ;;  %v2904_v53 = vmax.f32 %v625_v18, 0.0  ;;  %v1834_v10 = vpop.eup %1833 }
 0x165   :  { %v629_v9 = vmul.f32 %v1830_v17, %v3704_v31  ;;  %v1537_v54 = vsel %vm1525_vm5, %v2869_v35, 0.0  ;;  %v2909_v36 = vmax.f32 %v617_v25, 0.0  ;;  %v487_v40 = vsel %vm486_vm13, %v2337_v21, %v485_v41  ;;  %v3707_v25 = vld [vmem:[#allocation31_spill] sm:$0xff]  ;;  %v3709_v31 = vld [vmem:[#allocation34_spill] sm:$0xff] }
 0x166   :  { %v499_v20 = vmul.f32 %v1828_v16, %v2386_v48  ;;  %v589_v51 = vmul.f32 %v2596_v11, %v2780_v39  ;;  %v1538_v60 = vadd.f32 %v1537_v54, %v1536_v22  ;;  %vm495_vm4 = vcmp.eq.f32.partialorder %v2372_v46, 0.0  ;;  %758 = vperm.xlu0 %1724, %v2904_v53   ;;  %v1836_v37 = vpop.eup %1835  ;;  %723 = vperm.xlu1 %1723, %v2862_v14   ;;  %v3710_v54 = vld [vmem:[#allocation10_spill] sm:$0xff] }
 0x167   :  { %1847 = vrcp.f32 %v587_v8  ;;  %v1539_v7 = vsel %vm1525_vm5, %v2894_v38, 0.0  ;;  %v2921_v33 = vmax.f32 %v619_v6, 0.0  ;;  %v623_v49 = vmul.f32 %v1832_v5, %v3705_v27  ;;  %v3712_v27 = vld [vmem:[#allocation36_spill] sm:$0xff] }
 0x168   :  { %v480_v61 = vsel %vm479_vm14, %v2333_v42, %v478_v50  ;;  %v492_v39 = vmul.f32 %v2828_v45, %v2372_v46  ;;  %v594_v62 = vmul.f32 %v2596_v11, %v476_v57  ;;  %v1540_v24 = vadd.f32 %v1539_v7, %v1538_v60 }
 0x169   :  { %1849 = vrcp.f32 %v592_v1  ;;  %v2931_v26 = vmax.f32 %v629_v9, 0.0  ;;  %v633_v52 = vmul.f32 %v1834_v10, %v3706_v28  ;;  %v1541_v44 = vsel %vm1525_vm5, %v2909_v36, 0.0  ;;  %v1838_v56 = vpop.eup %1837  ;;  %v3711_v10 = vld [vmem:[#allocation22_spill] sm:$0xff] }
 0x16a   :  { %v490_v15 = vsel %vm488_vm15, %v489_v23, %v487_v40  ;;  %v501_v45 = vsel %vm500_vm1, %v2386_v48, %v499_v20  ;;  %v591_v16 = vmul.f32 %v2596_v11, %v2834_v13  ;;  %v1542_v12 = vadd.f32 %v1541_v44, %v1540_v24  ;;  %v1840_v18 = vpop.eup %1839  ;;  %728 = vperm.xlu1 %1723, %v2869_v35  }
 0x16b   :  { %1851 = vrcp.f32 %v589_v51  ;;  %768 = vperm.xlu0 %1724, %v2931_v26   ;;  %v1543_v63 = vsel %vm1525_vm5, %v2921_v33, 0.0  ;;  %v2948_v47 = vmax.f32 %v623_v49, 0.0  ;;  %v627_v21 = vmul.f32 %v1836_v37, %v3707_v25  ;;  %v1842_v50 = vpop.eup %1841  ;;  %v3713_v37 = vld [vmem:[#allocation13_spill] sm:$0xff] }
 0x16c   :  { %v483_v23 = vsel %vm481_vm0, %v482_v32, %v480_v61  ;;  %v503_v17 = vand.u32 2147483648, %v2386_v48  ;;  %v596_v13 = vmul.f32 %v2596_v11, %v490_v15  ;;  %v1544_v41 = vadd.f32 %v1543_v63, %v1542_v12  ;;  %v3714_v15 = vld [vmem:[#allocation11_spill] sm:$0xff] }
 0x16d   :  { %1853 = vrcp.f32 %v594_v62  ;;  %v1545_v8 = vsel %vm1525_vm5, %v2874_v2, 0.0  ;;  %v2960_v30 = vmax.f32 %v633_v52, 0.0  ;;  %v637_v6 = vmul.f32 %v1838_v56, %v3708_v43  ;;  %v3715_v63 = vld [vmem:[#allocation15_spill] sm:$0xff]  ;;  %v3716_v43 = vld [vmem:[#allocation12_spill] sm:$0xff] }
 0x16e   :  { %v504_v42 = vsel %vm502_vm2, %v503_v17, %v501_v45  ;;  %v494_v32 = vsel %vm493_vm9, %v2372_v46, %v492_v39  ;;  %v593_v5 = vmul.f32 %v2596_v11, %v2882_v0  ;;  %v1546_v57 = vadd.f32 %v1545_v8, %v1544_v41  ;;  %733 = vperm.xlu1 %1723, %v2894_v38  }
 0x16f   :  { %1855 = vrcp.f32 %v591_v16  ;;  %778 = vperm.xlu0 %1724, %v2960_v30   ;;  %v1547_v1 = vsel %vm1525_vm5, %v2948_v47, 0.0  ;;  %v2973_v22 = vmax.f32 %v627_v21, 0.0  ;;  %v631_v9 = vmul.f32 %v1840_v18, %v3709_v31  ;;  %v1844_v48 = vpop.eup %1843 }
 0x170   :  { %v547_v40 = vmul.f32 %v3711_v10, %v3710_v54  ;;  %v598_v20 = vmul.f32 %v2596_v11, %v504_v42  ;;  %v1548_v0 = vadd.f32 %v1547_v1, %v1546_v57  ;;  %1857 = vrcp.f32 %v596_v13  ;;  %v3717_v57 = vld [vmem:[#allocation17_spill] sm:$0xff] }
 0x171   :  { %v1846_v51 = vpop.eup %1845  ;;  %v1549_v60 = vsel %vm1525_vm5, %v2904_v53, 0.0  ;;  %v2982_v7 = vmax.f32 %v637_v6, 0.0  ;;  %v641_v49 = vmul.f32 %v1842_v50, %v3712_v27  ;;  %v552_v61 = vmul.f32 %v3711_v10, %v3713_v37 }
 0x172   :  { %v497_v39 = vsel %vm495_vm4, %v496_v59, %v494_v32  ;;  %v595_v62 = vmul.f32 %v2596_v11, %v483_v23  ;;  %v1550_v24 = vadd.f32 %v1549_v60, %v1548_v0  ;;  %1859 = vrcp.f32 %v593_v5  ;;  %738 = vperm.xlu1 %1723, %v2909_v36   ;;  %v3718_v0 = vld [vmem:[#allocation14_spill] sm:$0xff] }
 0x173   :  { %788 = vperm.xlu0 %1724, %v2982_v7   ;;  %v1551_v28 = vsel %vm1525_vm5, %v2973_v22, 0.0  ;;  %v2995_v52 = vmax.f32 %v631_v9, 0.0  ;;  %v635_v44 = vmul.f32 %v1844_v48, %v547_v40  ;;  %v549_v45 = vmul.f32 %v3711_v10, %v3714_v15 }
 0x174   :  { %v1848_v56 = vpop.eup %1847  ;;  %v1552_v46 = vadd.f32 %v1551_v28, %v1550_v24  ;;  %1861 = vrcp.f32 %v598_v20  ;;  %v1553_v59 = vsel %vm1525_vm5, %v2931_v26, 0.0  ;;  %v3002_v16 = vmax.f32 %v641_v49, 0.0 }
 0x175   :  { %v645_v12 = vmul.f32 %v1846_v51, %v552_v61  ;;  %v554_v25 = vmul.f32 %v3711_v10, %v3715_v63  ;;  %v597_v21 = vmul.f32 %v2596_v11, %v497_v39  ;;  %1863 = vrcp.f32 %v595_v62  ;;  %v3719_v39 = vld [vmem:[#allocation19_spill] sm:$0xff] }
 0x176   :  { %v1850_v18 = vpop.eup %1849  ;;  %v1554_v23 = vadd.f32 %v1553_v59, %v1552_v46  ;;  %v1555_v17 = vsel %vm1525_vm5, %v2995_v52, 0.0  ;;  %v3010_v13 = vmax.f32 %v635_v44, 0.0  ;;  %v639_v41 = vmul.f32 %v1848_v56, %v549_v45  ;;  %743 = vperm.xlu1 %1723, %v2921_v33   ;;  %v3720_v45 = vld [vmem:[#allocation16_spill] sm:$0xff] }
 0x177   :  { %798 = vperm.xlu0 %1724, %v3002_v16   ;;  %v551_v6 = vmul.f32 %v3711_v10, %v3716_v43  ;;  %v1557_v11 = vsel %vm1525_vm5, %v2960_v30, 0.0  ;;  %v3017_v42 = vmax.f32 %v645_v12, 0.0  ;;  %v649_v32 = vmul.f32 %v1850_v18, %v554_v25 }
 0x178   :  { %v1852_v50 = vpop.eup %1851  ;;  %v1556_v8 = vadd.f32 %v1555_v17, %v1554_v23  ;;  %v556_v1 = vmul.f32 %v3711_v10, %v3717_v57  ;;  %1865 = vrcp.f32 %v597_v21  ;;  %v1559_v9 = vsel %vm1525_vm5, %v3010_v13, 0.0  ;;  %v3721_v21 = vld [vmem:[#allocation21_spill] sm:$0xff] }
 0x179   :  { %v3024_v48 = vmax.f32 %v639_v41, 0.0  ;;  %v643_v54 = vmul.f32 %v1852_v50, %v551_v6  ;;  %v553_v51 = vmul.f32 %v3711_v10, %v3718_v0  ;;  %v1561_v60 = vsel %vm1525_vm5, %v2982_v7, 0.0  ;;  %v3722_v6 = vld [vmem:[#allocation18_spill] sm:$0xff]  ;;  %v3723_v0 = vld [vmem:[#allocation20_spill] sm:$0xff] }
 0x17a   :  { %v1854_v5 = vpop.eup %1853  ;;  %v1558_v31 = vadd.f32 %v1557_v11, %v1556_v8  ;;  %753 = vperm.xlu1 %1723, %v2948_v47   ;;  %v3031_v27 = vmax.f32 %v649_v32, 0.0  ;;  %v558_v62 = vmul.f32 %v3711_v10, %v3719_v39  ;;  %v555_v46 = vmul.f32 %v3711_v10, %v3720_v45 }
 0x17b   :  { %808 = vperm.xlu0 %1724, %v3017_v42   ;;  %v653_v49 = vmul.f32 %v1854_v5, %v556_v1  ;;  %v1563_v24 = vsel %vm1525_vm5, %v3024_v48, 0.0  ;;  %v3038_v28 = vmax.f32 %v643_v54, 0.0  ;;  %v1565_v59 = vsel %vm1525_vm5, %v3002_v16, 0.0 }
 0x17c   :  { %v1856_v40 = vpop.eup %1855  ;;  %v1560_v20 = vadd.f32 %v1559_v9, %v1558_v31  ;;  %v560_v23 = vmul.f32 %v3711_v10, %v3721_v21  ;;  %v557_v11 = vmul.f32 %v3711_v10, %v3722_v6  ;;  %v1569_v32 = vsel %vm1525_vm5, %v3017_v42, 0.0 }
 0x17d   :  { %v1858_v37 = vpop.eup %1857  ;;  %v647_v44 = vmul.f32 %v1856_v40, %v553_v51  ;;  %v3045_v12 = vmax.f32 %v653_v49, 0.0  ;;  %v1567_v17 = vsel %vm1525_vm5, %v3038_v28, 0.0  ;;  %v559_v51 = vmul.f32 %v3711_v10, %v3723_v0 }
 0x17e   :  { %v1562_v61 = vadd.f32 %v1561_v60, %v1560_v20  ;;  %763 = vperm.xlu1 %1723, %v2973_v22   ;;  %v657_v18 = vmul.f32 %v1858_v37, %v558_v62  ;;  %v1573_v60 = vsel %vm1525_vm5, %v3031_v27, 0.0  ;;  %vm1518_vm3 = vcmask 1041408  }
 0x17f   :  { %818 = vperm.xlu0 %1724, %v3031_v27   ;;  %v1860_v56 = vpop.eup %1859  ;;  %v3052_v41 = vmax.f32 %v647_v44, 0.0  ;;  %v1577_v10 = vsel %vm1525_vm5, %v3045_v12, 0.0  ;;  %vm1520_vm6 = vcmask 1042432   ;;  %vm3777_vm7 = vcmask 1040384  }
 0x180   :  { %v1564_v15 = vadd.f32 %v1563_v24, %v1562_v61  ;;  %v651_v50 = vmul.f32 %v1860_v56, %v555_v46  ;;  %v3059_v5 = vmax.f32 %v657_v18, 0.0  ;;  %v3647_v56 = vmov 1   ;;  %vm3779_vm8 = vmmov %vm3777_vm7 }
 0x181   :  { %v1862_v63 = vpop.eup %1861  ;;  %v1571_v31 = vsel %vm1525_vm5, %v3052_v41, 0.0  ;;  %vm1655_vm10 = vcmask 1043456   ;;  %vm1699_vm11 = vcmask 3072  }
 0x182   :  { %v1566_v25 = vadd.f32 %v1565_v59, %v1564_v15  ;;  %v1864_v8 = vpop.eup %1863  ;;  %773 = vperm.xlu1 %1723, %v2995_v52   ;;  %v661_v57 = vmul.f32 %v1862_v63, %v560_v23  ;;  %v3064_v9 = vmax.f32 %v651_v50, 0.0  ;;  %v1581_v59 = vsel %vm1525_vm5, %v3059_v5, 0.0 }
 0x183   :  { %828 = vperm.xlu0 %1724, %v3045_v12   ;;  %v655_v54 = vmul.f32 %v1864_v8, %v557_v11 }
 0x184   :  { %v1568_v43 = vadd.f32 %v1567_v17, %v1566_v25  ;;  %v3071_v49 = vmax.f32 %v661_v57, 0.0  ;;  %v1575_v61 = vsel %vm1525_vm5, %v3064_v9, 0.0  ;;  %v3093_v25 = vmax.f32 %v2790_v34, 0.0  ;;  %v1524_v57 = vld [vmem:[#allocation3] sm:$0x1] }
 0x185   :  { %v1866_v40 = vpop.eup %1865  ;;  %v3076_v39 = vmax.f32 %v655_v54, 0.0  ;;  %v3644_v54 = vmov 2  }
 0x186   :  { %v1570_v1 = vadd.f32 %v1569_v32, %v1568_v43  ;;  %783 = vperm.xlu1 %1723, %v3010_v13   ;;  %v659_v62 = vmul.f32 %v1866_v40, %v559_v51  ;;  %v1585_v23 = vsel %vm1525_vm5, %v3071_v49, 0.0  ;;  %v1587_v50 = vsel %vm1525_vm5, %v3093_v25, 0.0 }
 0x187   :  { %838 = vperm.xlu0 %1724, %v3059_v5   ;;  %v1579_v15 = vsel %vm1525_vm5, %v3076_v39, 0.0  ;;  %v3645_v51 = vmov 3  }
 0x188   :  { %v1572_v20 = vadd.f32 %v1571_v31, %v1570_v1  ;;  %v3084_v45 = vmax.f32 %v659_v62, 0.0 }
 0x18a   :  { %v1574_v37 = vadd.f32 %v1573_v60, %v1572_v20  ;;  %793 = vperm.xlu1 %1723, %v3024_v48   ;;  %v1583_v63 = vsel %vm1525_vm5, %v3084_v45, 0.0  ;;  %vm3724_vm5 = vcmask 24576  }
 0x18b   :  { %848 = vperm.xlu0 %1724, %v3071_v49  }
 0x18c   :  { %v1576_v24 = vadd.f32 %v1575_v61, %v1574_v37 }
 0x18e   :  { %v1578_v44 = vadd.f32 %v1577_v10, %v1576_v24  ;;  %803 = vperm.xlu1 %1723, %v3038_v28  }
 0x18f   :  { %1725 = vset.pattern.permute.xlu0 %v3647_v56 }
 0x190   :  { %926 = vperm.xlu0 %1725, %v2800_v19   ;;  %v1580_v46 = vadd.f32 %v1579_v15, %v1578_v44 }
 0x192   :  { %v1582_v18 = vadd.f32 %v1581_v59, %v1580_v46  ;;  %813 = vperm.xlu1 %1723, %v3052_v41  }
 0x194   :  { %938 = vperm.xlu0 %1725, %v2826_v3   ;;  %v1584_v21 = vadd.f32 %v1583_v63, %v1582_v18 }
 0x196   :  { %v1586_v17 = vadd.f32 %v1585_v23, %v1584_v21  ;;  %823 = vperm.xlu1 %1723, %v3064_v9  }
 0x198   :  { %946 = vperm.xlu0 %1725, %v2862_v14   ;;  %v1588_v8 = vadd.f32 %v1587_v50, %v1586_v17 }
 0x19a   :  { %v1589_v43 = vrot.slane %v1588_v8, 4  ;;  %833 = vperm.xlu1 %1723, %v3076_v39  }
 0x19c   :  { %954 = vperm.xlu0 %1725, %v2894_v38   ;;  %v1590_v34 = vadd.f32 %v1589_v43, %v1588_v8 }
 0x19e   :  { %v1591_v6 = vrot.slane %v1590_v34, 2  ;;  %843 = vperm.xlu1 %1723, %v3084_v45  }
 0x1a0   :  { %962 = vperm.xlu0 %1725, %v2921_v33   ;;  %v1592_v11 = vadd.f32 %v1591_v6, %v1590_v34 }
 0x1a2   :  { %v1593_v32 = vrot.slane %v1592_v11, 1  ;;  %853 = vperm.xlu1 %1723, %v3093_v25  }
 0x1a4   :  { %970 = vperm.xlu0 %1725, %v2948_v47   ;;  %v1594_v1 = vadd.f32 %v1593_v32, %v1592_v11 }
 0x1a6   :  { %v1595_v31 = vadd.f32 %v1594_v1, %v1524_v57  ;;  %1726 = vset.pattern.permute.xlu1 %v3647_v56 }
 0x1a7   :  { %930 = vperm.xlu1 %1726, %v2810_v55  }
 0x1a8   :  { %978 = vperm.xlu0 %1725, %v2973_v22   ;;  %1597 = vst.msk [vmem:[#allocation3] sm:$0x1] %vm3724_vm5, %v1595_v31 }
 0x1ab   :  { %934 = vperm.xlu1 %1726, %v2817_v29  }
 0x1ac   :  { %986 = vperm.xlu0 %1725, %v2995_v52  }
 0x1af   :  { %942 = vperm.xlu1 %1726, %v2842_v58  }
 0x1b0   :  { %994 = vperm.xlu0 %1725, %v3010_v13  }
 0x1b3   :  { %950 = vperm.xlu1 %1726, %v2869_v35  }
 0x1b4   :  { %1002 = vperm.xlu0 %1725, %v3024_v48  }
 0x1b7   :  { %958 = vperm.xlu1 %1726, %v2909_v36  }
 0x1b8   :  { %1010 = vperm.xlu0 %1725, %v3038_v28  }
 0x1bb   :  { %966 = vperm.xlu1 %1726, %v2874_v2  }
 0x1bc   :  { %1018 = vperm.xlu0 %1725, %v3052_v41  }
 0x1bf   :  { %974 = vperm.xlu1 %1726, %v2904_v53  }
 0x1c0   :  { %1026 = vperm.xlu0 %1725, %v3064_v9  }
 0x1c3   :  { %982 = vperm.xlu1 %1726, %v2931_v26  }
 0x1c4   :  { %1034 = vperm.xlu0 %1725, %v3076_v39  }
 0x1c7   :  { %990 = vperm.xlu1 %1726, %v2960_v30  }
 0x1c8   :  { %1042 = vperm.xlu0 %1725, %v3084_v45  }
 0x1cb   :  { %998 = vperm.xlu1 %1726, %v2982_v7  }
 0x1cc   :  { %1050 = vperm.xlu0 %1725, %v3093_v25  }
 0x1cf   :  { %1006 = vperm.xlu1 %1726, %v3002_v16  }
 0x1d0   :  { %1728 = vset.pattern.permute.xlu0 %v3644_v54 }
 0x1d1   :  { %1127 = vperm.xlu0 %1728, %v2810_v55   ;;  %v3134_v40 = vpop.permute.xlu1 %698 }
 0x1d3   :  { %1014 = vperm.xlu1 %1726, %v3017_v42   ;;  %v3140_v0 = vpop.permute.xlu0 %703 }
 0x1d5   :  { %1139 = vperm.xlu0 %1728, %v2842_v58   ;;  %v3138_v20 = vpop.permute.xlu1 %708 }
 0x1d7   :  { %1022 = vperm.xlu1 %1726, %v3031_v27  }
 0x1d9   :  { %1729 = vset.pattern.permute.xlu0 %v3645_v51  ;;  %v3145_v60 = vpop.permute.xlu1 %713 }
 0x1da   :  { %1320 = vperm.xlu0 %1729, %v2800_v19  }
 0x1db   :  { %1030 = vperm.xlu1 %1726, %v3045_v12  }
 0x1dd   :  { %v3148_v37 = vpop.permute.xlu0 %748  ;;  %v3151_v61 = vpop.permute.xlu1 %718 }
 0x1de   :  { %1332 = vperm.xlu0 %1729, %v2826_v3  }
 0x1df   :  { %1038 = vperm.xlu1 %1726, %v3059_v5  }
 0x1e1   :  { %v3154_v62 = vpop.permute.xlu0 %758  ;;  %v3157_v24 = vpop.permute.xlu1 %723 }
 0x1e2   :  { %1340 = vperm.xlu0 %1729, %v2862_v14  }
 0x1e3   :  { %1046 = vperm.xlu1 %1726, %v3071_v49  }
 0x1e5   :  { %v3163_v44 = vpop.permute.xlu1 %728 }
 0x1e6   :  { %v3160_v10 = vpop.permute.xlu0 %768  ;;  %1344 = vperm.xlu0 %1729, %v2869_v35  }
 0x1e7   :  { %1727 = vset.pattern.permute.xlu1 %v3644_v54 }
 0x1e8   :  { %1123 = vperm.xlu1 %1727, %v2800_v19  }
 0x1e9   :  { %v3170_v46 = vpop.permute.xlu1 %733 }
 0x1ea   :  { %v3166_v15 = vpop.permute.xlu0 %778  ;;  %1348 = vperm.xlu0 %1729, %v2894_v38  }
 0x1ec   :  { %1131 = vperm.xlu1 %1727, %v2817_v29  }
 0x1ed   :  { %v3176_v18 = vpop.permute.xlu1 %738 }
 0x1ee   :  { %v3172_v59 = vpop.permute.xlu0 %788  ;;  %1352 = vperm.xlu0 %1729, %v2909_v36  }
 0x1ef   :  { %3725 = vst [vmem:[#allocation24_spill] sm:$0xff] %v3172_v59 }
 0x1f0   :  { %1135 = vperm.xlu1 %1727, %v2826_v3  }
 0x1f1   :  { %v3182_v21 = vpop.permute.xlu1 %743 }
 0x1f2   :  { %v3178_v63 = vpop.permute.xlu0 %798  ;;  %1356 = vperm.xlu0 %1729, %v2921_v33  }
 0x1f3   :  { %3726 = vst [vmem:[#allocation23_spill] sm:$0xff] %v3178_v63 }
 0x1f4   :  { %1143 = vperm.xlu1 %1727, %v2862_v14  }
 0x1f5   :  { %v3188_v19 = vpop.permute.xlu1 %753 }
 0x1f6   :  { %v3184_v23 = vpop.permute.xlu0 %808  ;;  %1360 = vperm.xlu0 %1729, %v2874_v2  }
 0x1f7   :  { %3727 = vst [vmem:[#allocation27_spill] sm:$0xff] %v3184_v23 }
 0x1f8   :  { %1730 = vset.pattern.permute.xlu1 %v3645_v51  ;;  %v3244_v51 = vld [vmem:[#allocation6 + $0x8] sm:$0xff] }
 0x1f9   :  { %1324 = vperm.xlu1 %1730, %v2810_v55   ;;  %v3195_v50 = vpop.permute.xlu1 %763 }
 0x1fa   :  { %v3190_v17 = vpop.permute.xlu0 %818  ;;  %1364 = vperm.xlu0 %1729, %v2948_v47  }
 0x1fb   :  { %3728 = vst [vmem:[#allocation25_spill] sm:$0xff] %v3190_v17 }
 0x1fd   :  { %1328 = vperm.xlu1 %1730, %v2817_v29   ;;  %v3201_v8 = vpop.permute.xlu1 %773 }
 0x1fe   :  { %v3197_v3 = vpop.permute.xlu0 %828  ;;  %1368 = vperm.xlu0 %1729, %v2904_v53  }
 0x1ff   :  { %3729 = vst [vmem:[#allocation29_spill] sm:$0xff] %v3197_v3 }
 0x201   :  { %1336 = vperm.xlu1 %1730, %v2842_v58   ;;  %v3207_v43 = vpop.permute.xlu1 %783 }
 0x202   :  { %v3203_v14 = vpop.permute.xlu0 %838  ;;  %1372 = vperm.xlu0 %1729, %v2973_v22   ;;  %3731 = vst [vmem:[#allocation28_spill] sm:$0xff] %v3207_v43  ;;  %v3344_v43 = vld [vmem:[#allocation6 + $0x98] sm:$0xff] }
 0x203   :  { %3730 = vst [vmem:[#allocation26_spill] sm:$0xff] %v3203_v14  ;;  %v3258_v14 = vld [vmem:[#allocation6 + $0x18] sm:$0xff] }
 0x205   :  { %1731 = vset.pattern.permute.xlu1 %v3644_v54  ;;  %v3213_v55 = vpop.permute.xlu1 %793 }
 0x206   :  { %v3209_v34 = vpop.permute.xlu0 %848  ;;  %1376 = vperm.xlu0 %1729, %v2931_v26   ;;  %3733 = vst [vmem:[#allocation30_spill] sm:$0xff] %v3213_v55  ;;  %1147 = vperm.xlu1 %1731, %v2869_v35  }
 0x207   :  { %3732 = vst [vmem:[#allocation32_spill] sm:$0xff] %v3209_v34 }
 0x209   :  { %v3217_v6 = vpop.permute.xlu1 %803 }
 0x20a   :  { %1380 = vperm.xlu0 %1729, %v2995_v52   ;;  %3734 = vst [vmem:[#allocation33_spill] sm:$0xff] %v3217_v6  ;;  %1151 = vperm.xlu1 %1731, %v2894_v38  }
 0x20b   :  { %v927_v29 = vpop.permute.xlu0 %926 }
 0x20d   :  { %v3221_v11 = vpop.permute.xlu1 %813 }
 0x20e   :  { %1384 = vperm.xlu0 %1729, %v2960_v30   ;;  %3735 = vst [vmem:[#allocation31_spill] sm:$0xff] %v3221_v11  ;;  %1155 = vperm.xlu1 %1731, %v2909_v36  }
 0x20f   :  { %v939_v58 = vpop.permute.xlu0 %938 }
 0x211   :  { %v3225_v57 = vpop.permute.xlu1 %823 }
 0x212   :  { %1388 = vperm.xlu0 %1729, %v3010_v13   ;;  %3736 = vst [vmem:[#allocation35_spill] sm:$0xff] %v3225_v57  ;;  %1159 = vperm.xlu1 %1731, %v2921_v33  }
 0x213   :  { %v947_v32 = vpop.permute.xlu0 %946 }
 0x215   :  { %v3229_v1 = vpop.permute.xlu1 %833 }
 0x216   :  { %1392 = vperm.xlu0 %1729, %v2982_v7   ;;  %3737 = vst [vmem:[#allocation34_spill] sm:$0xff] %v3229_v1  ;;  %1163 = vperm.xlu1 %1731, %v2874_v2  }
 0x217   :  { %v955_v35 = vpop.permute.xlu0 %954 }
 0x219   :  { %v3233_v31 = vpop.permute.xlu1 %843 }
 0x21a   :  { %1396 = vperm.xlu0 %1729, %v3024_v48   ;;  %3738 = vst [vmem:[#allocation10_spill] sm:$0xff] %v3233_v31  ;;  %1167 = vperm.xlu1 %1731, %v2948_v47   ;;  %v3248_v47 = vld [vmem:[#allocation6] sm:$0xff]  ;;  %v3254_v31 = vld [vmem:[#allocation6 + $0x10] sm:$0xff] }
 0x21b   :  { %v963_v38 = vpop.permute.xlu0 %962  ;;  %v1053_v4 = vmul.f32 %v3248_v47, %v927_v29 }
 0x21d   :  { %v3237_v54 = vpop.permute.xlu1 %853 }
 0x21e   :  { %1400 = vperm.xlu0 %1729, %v3002_v16   ;;  %3739 = vst [vmem:[#allocation22_spill] sm:$0xff] %v3237_v54  ;;  %1171 = vperm.xlu1 %1731, %v2904_v53  }
 0x21f   :  { %v971_v36 = vpop.permute.xlu0 %970 }
 0x222   :  { %1404 = vperm.xlu0 %1729, %v3038_v28   ;;  %1175 = vperm.xlu1 %1731, %v2973_v22   ;;  %v931_v2 = vpop.permute.xlu1 %930 }
 0x223   :  { %v3241_v33 = vpop.permute.xlu0 %978  ;;  %v1054_v56 = vmul.f32 %v3244_v51, %v931_v2  ;;  %v1056_v2 = vmul.f32 %v3258_v14, %v939_v58 }
 0x225   :  { %v1085_v34 = vadd.f32 %v1054_v56, %v1053_v4  ;;  %v3268_v56 = vld [vmem:[#allocation6 + $0x28] sm:$0xff] }
 0x226   :  { %1408 = vperm.xlu0 %1729, %v3017_v42   ;;  %1179 = vperm.xlu1 %1731, %v2931_v26   ;;  %v935_v53 = vpop.permute.xlu1 %934  ;;  %v3264_v26 = vld [vmem:[#allocation6 + $0x20] sm:$0xff] }
 0x227   :  { %v3251_v54 = vpop.permute.xlu0 %986  ;;  %v1055_v22 = vmul.f32 %v3254_v31, %v935_v53  ;;  %v1058_v53 = vmul.f32 %v3268_v56, %v947_v32 }
 0x229   :  { %v1086_v3 = vadd.f32 %v1085_v34, %v1055_v22 }
 0x22a   :  { %1412 = vperm.xlu0 %1729, %v3052_v41   ;;  %1183 = vperm.xlu1 %1731, %v2995_v52   ;;  %v943_v29 = vpop.permute.xlu1 %942  ;;  %v3274_v52 = vld [vmem:[#allocation6 + $0x30] sm:$0xff] }
 0x22b   :  { %v3261_v1 = vpop.permute.xlu0 %994  ;;  %v1087_v57 = vadd.f32 %v1086_v3, %v1056_v2  ;;  %v1057_v4 = vmul.f32 %v3264_v26, %v943_v29  ;;  %v3278_v2 = vld [vmem:[#allocation6 + $0x38] sm:$0xff] }
 0x22c   :  { %v1060_v29 = vmul.f32 %v3278_v2, %v955_v35 }
 0x22d   :  { %v1088_v58 = vadd.f32 %v1087_v57, %v1057_v4 }
 0x22e   :  { %1416 = vperm.xlu0 %1729, %v3031_v27   ;;  %1187 = vperm.xlu1 %1731, %v2960_v30   ;;  %v951_v34 = vpop.permute.xlu1 %950  ;;  %v3284_v30 = vld [vmem:[#allocation6 + $0x40] sm:$0xff] }
 0x22f   :  { %v3271_v17 = vpop.permute.xlu0 %1002  ;;  %v1089_v22 = vadd.f32 %v1088_v58, %v1058_v53  ;;  %v1059_v3 = vmul.f32 %v3274_v52, %v951_v34  ;;  %v1603_v58 = vld [vmem:[#allocation3] sm:$0x1]  ;;  %v3288_v34 = vld [vmem:[#allocation6 + $0x48] sm:$0xff] }
 0x230   :  { %v1062_v23 = vmul.f32 %v3288_v34, %v963_v38 }
 0x231   :  { %v1090_v32 = vadd.f32 %v1089_v22, %v1059_v3  ;;  %v3294_v3 = vld [vmem:[#allocation6 + $0x50] sm:$0xff] }
 0x232   :  { %1420 = vperm.xlu0 %1729, %v3064_v9   ;;  %1191 = vperm.xlu1 %1731, %v3010_v13   ;;  %v959_v57 = vpop.permute.xlu1 %958 }
 0x233   :  { %v3281_v11 = vpop.permute.xlu0 %1010  ;;  %v1091_v4 = vadd.f32 %v1090_v32, %v1060_v29  ;;  %v1061_v53 = vmul.f32 %v3284_v30, %v959_v57  ;;  %v1604_v32 = vmax.f32 %v1603_v58, 1e-06  ;;  %v3298_v57 = vld [vmem:[#allocation6 + $0x58] sm:$0xff]  ;;  %v3308_v58 = vld [vmem:[#allocation6 + $0x68] sm:$0xff] }
 0x234   :  { %v1064_v63 = vmul.f32 %v3298_v57, %v971_v36 }
 0x235   :  { %v1092_v35 = vadd.f32 %v1091_v4, %v1061_v53  ;;  %v3304_v53 = vld [vmem:[#allocation6 + $0x60] sm:$0xff]  ;;  %1867 = vrcp.f32 %v1604_v32  ;;  %v3319_v32 = vld [vmem:[#allocation6 + $0x78] sm:$0xff] }
 0x236   :  { %1424 = vperm.xlu0 %1729, %v3045_v12   ;;  %1195 = vperm.xlu1 %1731, %v2982_v7   ;;  %v967_v22 = vpop.permute.xlu1 %966 }
 0x237   :  { %v3291_v6 = vpop.permute.xlu0 %1018  ;;  %v1093_v13 = vadd.f32 %v1092_v35, %v1062_v23  ;;  %v1063_v29 = vmul.f32 %v3294_v3, %v967_v22  ;;  %v1066_v35 = vmul.f32 %v3308_v58, %v3241_v33 }
 0x239   :  { %v1094_v38 = vadd.f32 %v1093_v13, %v1063_v29 }
 0x23a   :  { %1428 = vperm.xlu0 %1729, %v3076_v39   ;;  %1199 = vperm.xlu1 %1731, %v3024_v48   ;;  %v975_v4 = vpop.permute.xlu1 %974 }
 0x23b   :  { %v3301_v55 = vpop.permute.xlu0 %1026  ;;  %v1095_v7 = vadd.f32 %v1094_v38, %v1064_v63  ;;  %v1065_v23 = vmul.f32 %v3304_v53, %v975_v4  ;;  %v3315_v63 = vld [vmem:[#allocation6 + $0x70] sm:$0xff]  ;;  %v1068_v38 = vmul.f32 %v3319_v32, %v3251_v54 }
 0x23d   :  { %v1096_v22 = vadd.f32 %v1095_v7, %v1065_v23  ;;  %v3326_v23 = vld [vmem:[#allocation6 + $0x80] sm:$0xff] }
 0x23e   :  { %1432 = vperm.xlu0 %1729, %v3059_v5   ;;  %1203 = vperm.xlu1 %1731, %v3002_v16   ;;  %v983_v48 = vpop.permute.xlu1 %982  ;;  %3740 = vst [vmem:[#allocation36_spill] sm:$0xff] %v3326_v23 }
 0x23f   :  { %v3312_v36 = vpop.permute.xlu0 %1034  ;;  %v1097_v13 = vadd.f32 %v1096_v22, %v1066_v35  ;;  %v1067_v29 = vmul.f32 %v3315_v63, %v983_v48  ;;  %v3330_v22 = vld [vmem:[#allocation6 + $0x88] sm:$0xff] }
 0x240   :  { %3741 = vst [vmem:[#allocation13_spill] sm:$0xff] %v3330_v22  ;;  %v1070_v48 = vmul.f32 %v3330_v22, %v3261_v1  ;;  %v1072_v1 = vmul.f32 %v3344_v43, %v3271_v17  ;;  %v3744_v22 = vmov 1  }
 0x241   :  { %v1098_v33 = vadd.f32 %v1097_v13, %v1067_v29  ;;  %v3337_v29 = vld [vmem:[#allocation6 + $0x90] sm:$0xff] }
 0x242   :  { %1436 = vperm.xlu0 %1729, %v3084_v45   ;;  %1207 = vperm.xlu1 %1731, %v3038_v28   ;;  %v991_v7 = vpop.permute.xlu1 %990  ;;  %3742 = vst [vmem:[#allocation11_spill] sm:$0xff] %v3337_v29 }
 0x243   :  { %v3323_v4 = vpop.permute.xlu0 %1042  ;;  %v1099_v16 = vadd.f32 %v1098_v33, %v1068_v38  ;;  %v1069_v35 = vmul.f32 %v3326_v23, %v991_v7  ;;  %v1868_v33 = vpop.eup %1867  ;;  %v1602_v7 = vld [vmem:[%s3631_s2] sm:$0x1]  ;;  %v3357_v23 = vld [vmem:[#allocation6 + $0xa8] sm:$0xff] }
 0x244   :  { %v1074_v17 = vmul.f32 %v3357_v23, %v3281_v11 }
 0x245   :  { %v1100_v54 = vadd.f32 %v1099_v16, %v1069_v35 }
 0x246   :  { %1440 = vperm.xlu0 %1729, %v3071_v49   ;;  %1211 = vperm.xlu1 %1731, %v3017_v42   ;;  %v999_v13 = vpop.permute.xlu1 %998 }
 0x247   :  { %v3334_v59 = vpop.permute.xlu0 %1050  ;;  %v1101_v28 = vadd.f32 %v1100_v54, %v1070_v48  ;;  %v1071_v38 = vmul.f32 %v3337_v29, %v999_v13  ;;  %v3351_v48 = vmul.f32 %v1868_v33, %v1602_v7  ;;  %v3353_v13 = vld [vmem:[#allocation6 + $0xa0] sm:$0xff]  ;;  %v3363_v7 = vld [vmem:[#allocation6 + $0xb0] sm:$0xff] }
 0x248   :  { %3743 = vst [vmem:[#allocation15_spill] sm:$0xff] %v3353_v13  ;;  %3745 = vst [vmem:[#allocation12_spill] sm:$0xff] %v3363_v7 }
 0x249   :  { %v1102_v16 = vadd.f32 %v1101_v28, %v1071_v38 }
 0x24a   :  { %1444 = vperm.xlu0 %1729, %v3093_v25   ;;  %1215 = vperm.xlu1 %1731, %v3052_v41   ;;  %v1007_v35 = vpop.permute.xlu1 %1006 }
 0x24b   :  { %v1103_v54 = vadd.f32 %v1102_v16, %v1072_v1  ;;  %v1073_v29 = vmul.f32 %v3353_v13, %v1007_v35  ;;  %v3366_v16 = vld [vmem:[#allocation6 + $0xb8] sm:$0xff]  ;;  %v3746_v13 = vmov 3  }
 0x24c   :  { %v3348_v42 = vpop.permute.xlu0 %1127 }
 0x24d   :  { %v1104_v28 = vadd.f32 %v1103_v54, %v1073_v29  ;;  %v3374_v54 = vld [vmem:[#allocation6 + $0xc0] sm:$0xff] }
 0x24e   :  { %1733 = vset.pattern.permute.xlu0 %v3744_v22  ;;  %1219 = vperm.xlu1 %1731, %v3031_v27   ;;  %v1015_v41 = vpop.permute.xlu1 %1014  ;;  %v1076_v22 = vmul.f32 %v3366_v16, %v3291_v6  ;;  %3747 = vst [vmem:[#allocation17_spill] sm:$0xff] %v3374_v54 }
 0x24f   :  { %1618 = vperm.xlu0 %1733, %v3351_v48   ;;  %v1105_v33 = vadd.f32 %v1104_v28, %v1074_v17  ;;  %v1075_v1 = vmul.f32 %v3363_v7, %v1015_v41  ;;  %v3377_v28 = vld [vmem:[#allocation6 + $0xc8] sm:$0xff] }
 0x250   :  { %v1140_v38 = vpop.permute.xlu0 %1139  ;;  %v1078_v41 = vmul.f32 %v3377_v28, %v3301_v55 }
 0x251   :  { %v1106_v35 = vadd.f32 %v1105_v33, %v1075_v1  ;;  %v3384_v1 = vld [vmem:[#allocation6 + $0xd0] sm:$0xff] }
 0x252   :  { %1223 = vperm.xlu1 %1731, %v3064_v9   ;;  %v1023_v11 = vpop.permute.xlu1 %1022  ;;  %3748 = vst [vmem:[#allocation14_spill] sm:$0xff] %v3384_v1 }
 0x253   :  { %1736 = vset.pattern.permute.xlu0 %v3746_v13  ;;  %v1107_v27 = vadd.f32 %v1106_v35, %v1076_v22  ;;  %v1077_v17 = vmul.f32 %v3374_v54, %v1023_v11  ;;  %v3387_v35 = vld [vmem:[#allocation6 + $0xd8] sm:$0xff] }
 0x254   :  { %v1080_v11 = vmul.f32 %v3387_v35, %v3312_v36 }
 0x255   :  { %v3372_v29 = vpop.permute.xlu0 %1320  ;;  %v1108_v7 = vadd.f32 %v1107_v27, %v1077_v17  ;;  %v3394_v17 = vld [vmem:[#allocation6 + $0xe0] sm:$0xff] }
 0x256   :  { %1227 = vperm.xlu1 %1731, %v3045_v12   ;;  %v1031_v6 = vpop.permute.xlu1 %1030  ;;  %3749 = vst [vmem:[#allocation19_spill] sm:$0xff] %v3394_v17 }
 0x257   :  { %v1109_v9 = vadd.f32 %v1108_v7, %v1078_v41  ;;  %v1079_v22 = vmul.f32 %v3384_v1, %v1031_v6  ;;  %v3397_v41 = vld [vmem:[#allocation6 + $0xe8] sm:$0xff] }
 0x258   :  { %v1082_v6 = vmul.f32 %v3397_v41, %v3323_v4 }
 0x259   :  { %v3382_v33 = vpop.permute.xlu0 %1332  ;;  %v1110_v54 = vadd.f32 %v1109_v9, %v1079_v22  ;;  %v3404_v22 = vld [vmem:[#allocation6 + $0xf0] sm:$0xff] }
 0x25a   :  { %1231 = vperm.xlu1 %1731, %v3076_v39   ;;  %v1039_v55 = vpop.permute.xlu1 %1038  ;;  %3750 = vst [vmem:[#allocation16_spill] sm:$0xff] %v3404_v22 }
 0x25b   :  { %v1111_v12 = vadd.f32 %v1110_v54, %v1080_v11  ;;  %v1081_v7 = vmul.f32 %v3394_v17, %v1039_v55  ;;  %v3407_v11 = vld [vmem:[#allocation6 + $0xf8] sm:$0xff] }
 0x25c   :  { %v1084_v55 = vmul.f32 %v3407_v11, %v3334_v59 }
 0x25d   :  { %v3392_v27 = vpop.permute.xlu0 %1340  ;;  %v1112_v1 = vadd.f32 %v1111_v12, %v1081_v7 }
 0x25e   :  { %1235 = vperm.xlu1 %1731, %v3059_v5   ;;  %v1047_v36 = vpop.permute.xlu1 %1046 }
 0x25f   :  { %v1113_v39 = vadd.f32 %v1112_v1, %v1082_v6  ;;  %v1083_v54 = vmul.f32 %v3404_v22, %v1047_v36  ;;  %v1251_v1 = vmul.f32 %v3244_v51, %v3348_v42  ;;  %v3751_v42 = vmov 0  }
 0x261   :  { %v3402_v9 = vpop.permute.xlu0 %1344  ;;  %v1114_v17 = vadd.f32 %v1113_v39, %v1083_v54 }
 0x262   :  { %1239 = vperm.xlu1 %1731, %v3084_v45  }
 0x263   :  { %v3414_v12 = vadd.f32 %v1114_v17, %v1084_v55  ;;  %v1124_v5 = vpop.permute.xlu1 %1123  ;;  %v1254_v55 = vmul.f32 %v3264_v26, %v1140_v38  ;;  %v858_v38 = vmul.f32 %v3254_v31, %v3138_v20 }
 0x264   :  { %v1250_v7 = vmul.f32 %v3248_v47, %v1124_v5 }
 0x265   :  { %v3412_v4 = vpop.permute.xlu0 %1348 }
 0x266   :  { %1243 = vperm.xlu1 %1731, %v3071_v49   ;;  %v1282_v22 = vadd.f32 %v1251_v1, %v1250_v7  ;;  %v857_v49 = vmul.f32 %v3244_v51, %v3140_v0  ;;  %v856_v7 = vmul.f32 %v3248_v47, %v3134_v40  ;;  %v859_v0 = vmul.f32 %v3258_v14, %v3145_v60 }
 0x267   :  { %v1132_v36 = vpop.permute.xlu1 %1131  ;;  %v3752_v40 = vmov 2   ;;  %v1447_v60 = vmul.f32 %v3248_v47, %v3372_v29  ;;  %v1450_v47 = vmul.f32 %v3258_v14, %v3382_v33  ;;  %v1453_v33 = vmul.f32 %v3274_v52, %v3402_v9 }
 0x268   :  { %v1252_v59 = vmul.f32 %v3254_v31, %v1132_v36 }
 0x269   :  { %v3420_v6 = vpop.permute.xlu0 %1352 }
 0x26a   :  { %v1283_v39 = vadd.f32 %v1282_v22, %v1252_v59  ;;  %1247 = vperm.xlu1 %1731, %v3093_v25  }
 0x26b   :  { %v1136_v17 = vpop.permute.xlu1 %1135 }
 0x26c   :  { %v1253_v54 = vmul.f32 %v3258_v14, %v1136_v17 }
 0x26d   :  { %v3424_v45 = vpop.permute.xlu0 %1356 }
 0x26e   :  { %v1284_v5 = vadd.f32 %v1283_v39, %v1253_v54  ;;  %1732 = vset.pattern.permute.xlu1 %v3751_v42  ;;  %v888_v39 = vadd.f32 %v857_v49, %v856_v7  ;;  %v861_v49 = vmul.f32 %v3268_v56, %v3157_v24  ;;  %v863_v24 = vmul.f32 %v3278_v2, %v3170_v46 }
 0x26f   :  { %v1144_v22 = vpop.permute.xlu1 %1143  ;;  %1609 = vperm.xlu1 %1732, %v3351_v48   ;;  %v1452_v46 = vmul.f32 %v3268_v56, %v3392_v27  ;;  %v867_v27 = vmul.f32 %v3298_v57, %v3188_v19  ;;  %v869_v19 = vmul.f32 %v3308_v58, %v3195_v50  ;;  %v871_v50 = vmul.f32 %v3319_v32, %v3201_v8 }
 0x270   :  { %v1285_v25 = vadd.f32 %v1284_v5, %v1254_v55  ;;  %v1255_v36 = vmul.f32 %v3268_v56, %v1144_v22  ;;  %v889_v42 = vadd.f32 %v888_v39, %v858_v38  ;;  %v860_v55 = vmul.f32 %v3264_v26, %v3151_v61 }
 0x271   :  { %v3433_v1 = vpop.permute.xlu0 %1360 }
 0x272   :  { %v3439_v59 = vadd.f32 %v1285_v25, %v1255_v36  ;;  %v890_v20 = vadd.f32 %v889_v42, %v859_v0  ;;  %v862_v36 = vmul.f32 %v3274_v52, %v3163_v44 }
 0x273   :  { %1734 = vset.pattern.permute.xlu1 %v3752_v40  ;;  %v864_v40 = vmul.f32 %v3284_v30, %v3176_v18 }
 0x274   :  { %v1325_v54 = vpop.permute.xlu1 %1324  ;;  %1627 = vperm.xlu1 %1734, %v3351_v48   ;;  %v891_v25 = vadd.f32 %v890_v20, %v860_v55 }
 0x275   :  { %v3443_v17 = vpop.permute.xlu0 %1364  ;;  %v1448_v5 = vmul.f32 %v3244_v51, %v1325_v54 }
 0x276   :  { %v892_v51 = vadd.f32 %v891_v25, %v861_v49 }
 0x277   :  { %v1479_v38 = vadd.f32 %v1448_v5, %v1447_v60 }
 0x278   :  { %v1329_v22 = vpop.permute.xlu1 %1328  ;;  %1735 = vset.pattern.permute.xlu1 %v3746_v13  ;;  %v893_v13 = vadd.f32 %v892_v51, %v862_v36  ;;  %v1455_v36 = vmul.f32 %v3284_v30, %v3420_v6  ;;  %v1457_v6 = vmul.f32 %v3294_v3, %v3433_v1 }
 0x279   :  { %v1369_v7 = vpop.permute.xlu0 %1368  ;;  %v1449_v61 = vmul.f32 %v3254_v31, %v1329_v22  ;;  %1636 = vperm.xlu1 %1735, %v3351_v48   ;;  %v865_v48 = vmul.f32 %v3288_v34, %v3182_v21  ;;  %v1454_v21 = vmul.f32 %v3278_v2, %v3412_v4  ;;  %v1456_v4 = vmul.f32 %v3288_v34, %v3424_v45 }
 0x27a   :  { %v894_v31 = vadd.f32 %v893_v13, %v863_v24  ;;  %v1458_v45 = vmul.f32 %v3298_v57, %v3443_v17  ;;  %v1459_v1 = vmul.f32 %v3304_v53, %v1369_v7 }
 0x27b   :  { %v1480_v39 = vadd.f32 %v1479_v38, %v1449_v61 }
 0x27c   :  { %v1337_v0 = vpop.permute.xlu1 %1336  ;;  %v895_v14 = vadd.f32 %v894_v31, %v864_v40 }
 0x27d   :  { %v1373_v29 = vpop.permute.xlu0 %1372  ;;  %v1481_v44 = vadd.f32 %v1480_v39, %v1450_v47  ;;  %v1451_v54 = vmul.f32 %v3264_v26, %v1337_v0  ;;  %v866_v26 = vmul.f32 %v3294_v3, %v3148_v37  ;;  %v868_v37 = vmul.f32 %v3304_v53, %v3154_v62 }
 0x27e   :  { %v896_v18 = vadd.f32 %v895_v14, %v865_v48  ;;  %v870_v62 = vmul.f32 %v3315_v63, %v3160_v10  ;;  %v3753_v10 = vld [vmem:[#allocation36_spill] sm:$0xff]  ;;  %v1460_v17 = vmul.f32 %v3308_v58, %v1373_v29 }
 0x27f   :  { %v1482_v55 = vadd.f32 %v1481_v44, %v1451_v54 }
 0x280   :  { %v897_v56 = vadd.f32 %v896_v18, %v866_v26  ;;  %v872_v26 = vmul.f32 %v3753_v10, %v3166_v15 }
 0x281   :  { %v1377_v42 = vpop.permute.xlu0 %1376  ;;  %v1483_v5 = vadd.f32 %v1482_v55, %v1452_v46  ;;  %v3472_v20 = vpop.permute.xlu1 %1147 }
 0x282   :  { %v898_v61 = vadd.f32 %v897_v56, %v867_v27  ;;  %v3754_v27 = vld [vmem:[#allocation28_spill] sm:$0xff]  ;;  %v1461_v7 = vmul.f32 %v3315_v63, %v1377_v42 }
 0x283   :  { %v1484_v60 = vadd.f32 %v1483_v5, %v1453_v33 }
 0x284   :  { %v899_v39 = vadd.f32 %v898_v61, %v868_v37 }
 0x285   :  { %v1381_v49 = vpop.permute.xlu0 %1380  ;;  %v3478_v22 = vpop.permute.xlu1 %1151  ;;  %v1485_v25 = vadd.f32 %v1484_v60, %v1454_v21 }
 0x286   :  { %v900_v44 = vadd.f32 %v899_v39, %v869_v19  ;;  %v3756_v39 = vld [vmem:[#allocation24_spill] sm:$0xff]  ;;  %v3757_v19 = vld [vmem:[#allocation11_spill] sm:$0xff]  ;;  %v1462_v15 = vmul.f32 %v3319_v32, %v1381_v49 }
 0x287   :  { %v1486_v51 = vadd.f32 %v1485_v25, %v1455_v36  ;;  %v3755_v25 = vld [vmem:[#allocation13_spill] sm:$0xff] }
 0x288   :  { %v901_v46 = vadd.f32 %v900_v44, %v870_v62  ;;  %v873_v8 = vmul.f32 %v3755_v25, %v3754_v27  ;;  %v3761_v27 = vld [vmem:[#allocation33_spill] sm:$0xff] }
 0x289   :  { %v1385_v9 = vpop.permute.xlu0 %1384  ;;  %v3484_v38 = vpop.permute.xlu1 %1155  ;;  %v1487_v0 = vadd.f32 %v1486_v51, %v1456_v4 }
 0x28a   :  { %v902_v5 = vadd.f32 %v901_v46, %v871_v50  ;;  %v1463_v46 = vmul.f32 %v3753_v10, %v1385_v9  ;;  %v1256_v9 = vmul.f32 %v3274_v52, %v3472_v20  ;;  %v3764_v52 = vld [vmem:[#allocation31_spill] sm:$0xff] }
 0x28b   :  { %v1488_v54 = vadd.f32 %v1487_v0, %v1457_v6  ;;  %v874_v0 = vmul.f32 %v3757_v19, %v3756_v39  ;;  %v879_v20 = vmul.f32 %v3366_v16, %v3764_v52  ;;  %v3768_v52 = vld [vmem:[#allocation29_spill] sm:$0xff] }
 0x28c   :  { %v903_v56 = vadd.f32 %v902_v5, %v872_v26  ;;  %v3759_v5 = vld [vmem:[#allocation23_spill] sm:$0xff] }
 0x28d   :  { %v1389_v24 = vpop.permute.xlu0 %1388  ;;  %v3490_v47 = vpop.permute.xlu1 %1159  ;;  %v1489_v55 = vadd.f32 %v1488_v54, %v1458_v45  ;;  %v3758_v54 = vld [vmem:[#allocation30_spill] sm:$0xff] }
 0x28e   :  { %v904_v37 = vadd.f32 %v903_v56, %v873_v8  ;;  %v875_v62 = vmul.f32 %v3344_v43, %v3758_v54  ;;  %v877_v8 = vmul.f32 %v3357_v23, %v3761_v27 }
 0x28f   :  { %v1490_v18 = vadd.f32 %v1489_v55, %v1459_v1 }
 0x290   :  { %v905_v44 = vadd.f32 %v904_v37, %v874_v0 }
 0x291   :  { %v1393_v13 = vpop.permute.xlu0 %1392  ;;  %v3496_v40 = vpop.permute.xlu1 %1163  ;;  %v1491_v36 = vadd.f32 %v1490_v18, %v1460_v17  ;;  %v3760_v18 = vld [vmem:[#allocation15_spill] sm:$0xff]  ;;  %v1464_v17 = vmul.f32 %v3755_v25, %v1389_v24 }
 0x292   :  { %v906_v55 = vadd.f32 %v905_v44, %v875_v62  ;;  %v876_v26 = vmul.f32 %v3760_v18, %v3759_v5  ;;  %v3762_v24 = vld [vmem:[#allocation27_spill] sm:$0xff]  ;;  %v3763_v44 = vld [vmem:[#allocation12_spill] sm:$0xff] }
 0x293   :  { %v1492_v4 = vadd.f32 %v1491_v36, %v1461_v7  ;;  %v1465_v7 = vmul.f32 %v3757_v19, %v1393_v13  ;;  %v878_v54 = vmul.f32 %v3763_v44, %v3762_v24  ;;  %v1258_v13 = vmul.f32 %v3284_v30, %v3484_v38 }
 0x294   :  { %v907_v56 = vadd.f32 %v906_v55, %v876_v26 }
 0x295   :  { %v1397_v31 = vpop.permute.xlu0 %1396  ;;  %v3502_v48 = vpop.permute.xlu1 %1167  ;;  %v1493_v45 = vadd.f32 %v1492_v4, %v1462_v15  ;;  %v1257_v15 = vmul.f32 %v3278_v2, %v3478_v22  ;;  %v1259_v2 = vmul.f32 %v3288_v34, %v3490_v47 }
 0x296   :  { %v908_v39 = vadd.f32 %v907_v56, %v877_v8  ;;  %v1466_v62 = vmul.f32 %v3344_v43, %v1397_v31  ;;  %v1261_v38 = vmul.f32 %v3298_v57, %v3502_v48  ;;  %v3765_v8 = vld [vmem:[#allocation25_spill] sm:$0xff] }
 0x297   :  { %v1494_v42 = vadd.f32 %v1493_v45, %v1463_v46  ;;  %v1287_v46 = vadd.f32 %v3439_v59, %v1256_v9  ;;  %v1260_v59 = vmul.f32 %v3294_v3, %v3496_v40 }
 0x298   :  { %v909_v55 = vadd.f32 %v908_v39, %v878_v54 }
 0x299   :  { %v1401_v14 = vpop.permute.xlu0 %1400  ;;  %v3507_v33 = vpop.permute.xlu1 %1171  ;;  %v1495_v36 = vadd.f32 %v1494_v42, %v1464_v17  ;;  %v1288_v5 = vadd.f32 %v1287_v46, %v1257_v15  ;;  %v3767_v15 = vld [vmem:[#allocation35_spill] sm:$0xff] }
 0x29a   :  { %v1467_v26 = vmul.f32 %v3760_v18, %v1401_v14  ;;  %v910_v56 = vadd.f32 %v909_v55, %v879_v20  ;;  %v1262_v14 = vmul.f32 %v3304_v53, %v3507_v33  ;;  %v881_v3 = vmul.f32 %v3377_v28, %v3767_v15  ;;  %v3769_v20 = vld [vmem:[#allocation14_spill] sm:$0xff] }
 0x29b   :  { %v1496_v0 = vadd.f32 %v1495_v36, %v1465_v7  ;;  %v1289_v31 = vadd.f32 %v1288_v5, %v1258_v13  ;;  %v3766_v36 = vld [vmem:[#allocation17_spill] sm:$0xff] }
 0x29c   :  { %v880_v7 = vmul.f32 %v3766_v36, %v3765_v8 }
 0x29d   :  { %v1405_v60 = vpop.permute.xlu0 %1404  ;;  %v3512_v21 = vpop.permute.xlu1 %1175  ;;  %v1497_v42 = vadd.f32 %v1496_v0, %v1466_v62  ;;  %v1290_v30 = vadd.f32 %v1289_v31, %v1259_v2 }
 0x29e   :  { %v1468_v9 = vmul.f32 %v3357_v23, %v1405_v60  ;;  %v911_v0 = vadd.f32 %v910_v56, %v880_v7  ;;  %v1263_v57 = vmul.f32 %v3308_v58, %v3512_v21  ;;  %v3772_v7 = vld [vmem:[#allocation19_spill] sm:$0xff] }
 0x29f   :  { %v1498_v27 = vadd.f32 %v1497_v42, %v1467_v26  ;;  %v1291_v47 = vadd.f32 %v1290_v30, %v1260_v59  ;;  %v882_v42 = vmul.f32 %v3769_v20, %v3768_v52 }
 0x2a0   :  { %v912_v46 = vadd.f32 %v911_v0, %v881_v3  ;;  %v3773_v0 = vld [vmem:[#allocation10_spill] sm:$0xff] }
 0x2a1   :  { %v1409_v61 = vpop.permute.xlu0 %1408  ;;  %v1180_v51 = vpop.permute.xlu1 %1179  ;;  %v1499_v40 = vadd.f32 %v1498_v27, %v1468_v9  ;;  %v1292_v24 = vadd.f32 %v1291_v47, %v1261_v38 }
 0x2a2   :  { %v1469_v48 = vmul.f32 %v3763_v44, %v1409_v61  ;;  %v1264_v60 = vmul.f32 %v3315_v63, %v1180_v51  ;;  %v913_v21 = vadd.f32 %v912_v46, %v882_v42  ;;  %v3770_v61 = vld [vmem:[#allocation34_spill] sm:$0xff]  ;;  %v3774_v46 = vld [vmem:[#allocation32_spill] sm:$0xff] }
 0x2a3   :  { %v1293_v62 = vadd.f32 %v1292_v24, %v1262_v14  ;;  %v883_v31 = vmul.f32 %v3387_v35, %v3770_v61 }
 0x2a4   :  { %v1500_v13 = vadd.f32 %v1499_v40, %v1469_v48 }
 0x2a5   :  { %v1184_v6 = vpop.permute.xlu1 %1183  ;;  %v1413_v29 = vpop.permute.xlu0 %1412  ;;  %v1294_v55 = vadd.f32 %v1293_v62, %v1263_v57  ;;  %v914_v30 = vadd.f32 %v913_v21, %v883_v31 }
 0x2a6   :  { %v1265_v53 = vmul.f32 %v3319_v32, %v1184_v6  ;;  %v1470_v5 = vmul.f32 %v3366_v16, %v1413_v29 }
 0x2a7   :  { %v1295_v26 = vadd.f32 %v1294_v55, %v1264_v60 }
 0x2a8   :  { %v1501_v63 = vadd.f32 %v1500_v13, %v1470_v5  ;;  %v3775_v13 = vld [vmem:[#allocation16_spill] sm:$0xff] }
 0x2a9   :  { %v1188_v50 = vpop.permute.xlu1 %1187  ;;  %v3523_v1 = vpop.permute.xlu0 %1416  ;;  %v1296_v51 = vadd.f32 %v1295_v26, %v1265_v53 }
 0x2aa   :  { %v1266_v58 = vmul.f32 %v3753_v10, %v1188_v50  ;;  %v1471_v32 = vmul.f32 %v3766_v36, %v3523_v1  ;;  %v3771_v50 = vld [vmem:[#allocation26_spill] sm:$0xff] }
 0x2ab   :  { %v884_v9 = vmul.f32 %v3772_v7, %v3771_v50 }
 0x2ac   :  { %v1297_v56 = vadd.f32 %v1296_v51, %v1266_v58  ;;  %v1502_v38 = vadd.f32 %v1501_v63, %v1471_v32  ;;  %v1116_v32 = vrot.slane %v3414_v12, 4 }
 0x2ad   :  { %v1192_v49 = vpop.permute.xlu1 %1191  ;;  %v3533_v4 = vpop.permute.xlu0 %1420  ;;  %v915_v14 = vadd.f32 %v914_v30, %v884_v9 }
 0x2ae   :  { %v1267_v59 = vmul.f32 %v3755_v25, %v1192_v49  ;;  %v1472_v47 = vmul.f32 %v3377_v28, %v3533_v4 }
 0x2b0   :  { %v1298_v8 = vadd.f32 %v1297_v56, %v1267_v59 }
 0x2b1   :  { %v1196_v37 = vpop.permute.xlu1 %1195  ;;  %v1425_v22 = vpop.permute.xlu0 %1424 }
 0x2b2   :  { %v1268_v27 = vmul.f32 %v3757_v19, %v1196_v37  ;;  %v885_v19 = vmul.f32 %v3397_v41, %v3773_v0  ;;  %v1503_v37 = vadd.f32 %v1502_v38, %v1472_v47  ;;  %v1473_v15 = vmul.f32 %v3769_v20, %v1425_v22 }
 0x2b3   :  { %v886_v22 = vmul.f32 %v3775_v13, %v3774_v46 }
 0x2b4   :  { %v1299_v49 = vadd.f32 %v1298_v8, %v1268_v27  ;;  %v916_v48 = vadd.f32 %v915_v14, %v885_v19  ;;  %v1504_v62 = vadd.f32 %v1503_v37, %v1473_v15  ;;  %v1117_v8 = vadd.f32 %v1116_v32, %v3414_v12 }
 0x2b5   :  { %v1200_v45 = vpop.permute.xlu1 %1199  ;;  %v1429_v39 = vpop.permute.xlu0 %1428 }
 0x2b6   :  { %v1269_v10 = vmul.f32 %v3344_v43, %v1200_v45  ;;  %v1474_v45 = vmul.f32 %v3387_v35, %v1429_v39  ;;  %v917_v42 = vadd.f32 %v916_v48, %v886_v22 }
 0x2b8   :  { %v1300_v3 = vadd.f32 %v1299_v49, %v1269_v10  ;;  %v1505_v55 = vadd.f32 %v1504_v62, %v1474_v45 }
 0x2b9   :  { %v1204_v17 = vpop.permute.xlu1 %1203  ;;  %v1433_v33 = vpop.permute.xlu0 %1432 }
 0x2ba   :  { %v1270_v1 = vmul.f32 %v3760_v18, %v1204_v17  ;;  %v1475_v18 = vmul.f32 %v3772_v7, %v1433_v33 }
 0x2bc   :  { %v1301_v57 = vadd.f32 %v1300_v3, %v1270_v1  ;;  %v1506_v5 = vadd.f32 %v1505_v55, %v1475_v18 }
 0x2bd   :  { %v1208_v34 = vpop.permute.xlu1 %1207  ;;  %v1437_v29 = vpop.permute.xlu0 %1436 }
 0x2be   :  { %v1271_v43 = vmul.f32 %v3357_v23, %v1208_v34  ;;  %v1476_v53 = vmul.f32 %v3397_v41, %v1437_v29 }
 0x2c0   :  { %v1302_v17 = vadd.f32 %v1301_v57, %v1271_v43 }
 0x2c1   :  { %v1212_v54 = vpop.permute.xlu1 %1211  ;;  %v1441_v40 = vpop.permute.xlu0 %1440 }
 0x2c2   :  { %v1272_v4 = vmul.f32 %v3763_v44, %v1212_v54  ;;  %v3776_v44 = vld [vmem:[#allocation22_spill] sm:$0xff]  ;;  %v1477_v33 = vmul.f32 %v3775_v13, %v1441_v40 }
 0x2c3   :  { %v887_v54 = vmul.f32 %v3407_v11, %v3776_v44 }
 0x2c4   :  { %v1303_v39 = vadd.f32 %v1302_v17, %v1272_v4 }
 0x2c5   :  { %v1216_v2 = vpop.permute.xlu1 %1215  ;;  %v1445_v34 = vpop.permute.xlu0 %1444  ;;  %v918_v63 = vadd.f32 %v917_v42, %v887_v54 }
 0x2c6   :  { %v1273_v60 = vmul.f32 %v3366_v16, %v1216_v2  ;;  %v1507_v2 = vadd.f32 %v1506_v5, %v1476_v53  ;;  %v1478_v58 = vmul.f32 %v3407_v11, %v1445_v34 }
 0x2c8   :  { %v1304_v26 = vadd.f32 %v1303_v39, %v1273_v60  ;;  %v1508_v51 = vadd.f32 %v1507_v2, %v1477_v33 }
 0x2c9   :  { %v1220_v6 = vpop.permute.xlu1 %1219 }
 0x2ca   :  { %v1274_v52 = vmul.f32 %v3766_v36, %v1220_v6  ;;  %v1509_v6 = vadd.f32 %v1508_v51, %v1478_v58  ;;  %v1619_v34 = vpop.permute.xlu0 %1618 }
 0x2cc   :  { %v1305_v61 = vadd.f32 %v1304_v26, %v1274_v52  ;;  %v1510_v10 = vrot.slane %v1509_v6, 4  ;;  %v3778_v52 = vld [vmem:[#allocation9_spill] sm:$0xff] }
 0x2cd   :  { %v1224_v25 = vpop.permute.xlu1 %1223  ;;  %v1624_v42 = vrot.slane %v1619_v34, %v3778_v52 }
 0x2ce   :  { %v1275_v16 = vmul.f32 %v3377_v28, %v1224_v25  ;;  %v919_v28 = vrot.slane %v918_v63, 4  ;;  %v1118_v25 = vrot.slane %v1117_v8, 2  ;;  %v1511_v49 = vadd.f32 %v1510_v10, %v1509_v6 }
 0x2d0   :  { %v1306_v36 = vadd.f32 %v1305_v61, %v1275_v16  ;;  %v920_v47 = vadd.f32 %v919_v28, %v918_v63  ;;  %v1119_v37 = vadd.f32 %v1118_v25, %v1117_v8  ;;  %v1512_v15 = vrot.slane %v1511_v49, 2  ;;  %v1713_v61 = vld [vmem:[%s3635_s6] ss:$0 sm:$0xff] }
 0x2d1   :  { %v1228_v24 = vpop.permute.xlu1 %1227 }
 0x2d2   :  { %v1276_v31 = vmul.f32 %v3769_v20, %v1228_v24  ;;  %v1120_v40 = vrot.slane %v1119_v37, 1  ;;  %v1513_v43 = vadd.f32 %v1512_v15, %v1511_v49 }
 0x2d4   :  { %v1307_v27 = vadd.f32 %v1306_v36, %v1276_v31  ;;  %v1121_v4 = vadd.f32 %v1120_v40, %v1119_v37  ;;  %v1514_v48 = vrot.slane %v1513_v43, 1  ;;  %v1711_v31 = vld [vmem:[%s3633_s4] ss:$0 sm:$0xff] }
 0x2d5   :  { %v1232_v23 = vpop.permute.xlu1 %1231 }
 0x2d6   :  { %v1277_v59 = vmul.f32 %v3387_v35, %v1232_v23  ;;  %v1515_v46 = vadd.f32 %v1514_v48, %v1513_v43 }
 0x2d8   :  { %v1308_v30 = vadd.f32 %v1307_v27, %v1277_v59  ;;  %v1712_v27 = vld [vmem:[#allocation4] ss:$0 sm:$0xff] }
 0x2d9   :  { %v1236_v21 = vpop.permute.xlu1 %1235 }
 0x2da   :  { %v1278_v29 = vmul.f32 %v3772_v7, %v1236_v21  ;;  %v921_v7 = vrot.slane %v920_v47, 2 }
 0x2dc   :  { %v1309_v50 = vadd.f32 %v1308_v30, %v1278_v29  ;;  %v922_v3 = vadd.f32 %v921_v7, %v920_v47 }
 0x2dd   :  { %v1240_v56 = vpop.permute.xlu1 %1239 }
 0x2de   :  { %v1279_v38 = vmul.f32 %v3397_v41, %v1240_v56  ;;  %v923_v24 = vrot.slane %v922_v3, 1  ;;  %v1714_v56 = vld [vmem:[#allocation5] ss:$0 sm:$0xff] }
 0x2e0   :  { %v1310_v35 = vadd.f32 %v1309_v50, %v1279_v38  ;;  %v924_v18 = vadd.f32 %v923_v24, %v922_v3 }
 0x2e1   :  { %v1244_v20 = vpop.permute.xlu1 %1243 }
 0x2e2   :  { %v1280_v9 = vmul.f32 %v3775_v13, %v1244_v20  ;;  %v1516_v13 = vld [vmem:[#allocation2] sm:$0xf] }
 0x2e4   :  { %v1311_v14 = vadd.f32 %v1310_v35, %v1280_v9 }
 0x2e5   :  { %v1248_v1 = vpop.permute.xlu1 %1247 }
 0x2e6   :  { %v1281_v0 = vmul.f32 %v3407_v11, %v1248_v1  ;;  %v1517_v11 = vsel %vm3777_vm7, %v924_v18, %v1121_v4 }
 0x2e8   :  { %v1312_v19 = vadd.f32 %v1311_v14, %v1281_v0 }
 0x2ea   :  { %v1313_v41 = vrot.slane %v1312_v19, 4  ;;  %v1610_v17 = vpop.permute.xlu1 %1609 }
 0x2eb   :  { %v1615_v44 = vrot.slane %v1610_v17, %v3778_v52 }
 0x2ec   :  { %v1314_v12 = vadd.f32 %v1313_v41, %v1312_v19 }
 0x2ee   :  { %v1315_v45 = vrot.slane %v1314_v12, 2 }
 0x2ef   :  { %v1628_v23 = vpop.permute.xlu1 %1627 }
 0x2f0   :  { %v1316_v57 = vadd.f32 %v1315_v45, %v1314_v12  ;;  %v1633_v54 = vrot.slane %v1628_v23, %v3778_v52 }
 0x2f2   :  { %v1317_v62 = vrot.slane %v1316_v57, 1 }
 0x2f4   :  { %v1318_v60 = vadd.f32 %v1317_v62, %v1316_v57  ;;  %v1637_v39 = vpop.permute.xlu1 %1636 }
 0x2f5   :  { %v1642_v2 = vrot.slane %v1637_v39, %v3778_v52 }
 0x2f6   :  { %v1519_v22 = vsel %vm1518_vm3, %v1517_v11, %v1318_v60 }
 0x2f7   :  { %v1521_v55 = vsel %vm1520_vm6, %v1519_v22, %v1515_v46 }
 0x2f8   :  { %v1522_v53 = vadd.f32 %v1521_v55, %v1516_v13 }
 0x2fa   :  { %1523 = vst [vmem:[#allocation2] sm:$0xf] %v1522_v53 }
 0x301   :  { %v1601_v5 = vld [vmem:[#allocation2] sm:$0xf] }
 0x302   :  { %v1616_v33 = vmul.f32 %v1615_v44, %v1601_v5  ;;  %v1625_v26 = vmul.f32 %v1624_v42, %v1601_v5  ;;  %v1634_v16 = vmul.f32 %v1633_v54, %v1601_v5  ;;  %v1643_v21 = vmul.f32 %v1642_v2, %v1601_v5 }
 0x304   :  { %v1644_v58 = vsel %vm3779_vm8, %v1616_v33, %v1625_v26 }
 0x305   :  { %v1645_v63 = vsel %vm1518_vm3, %v1644_v58, %v1634_v16 }
 0x306   :  { %v1646_v51 = vsel %vm1520_vm6, %v1645_v63, %v1643_v21 }
 0x307   :  { %v1674_v36 = vmul.f32 %v1713_v61, %v1646_v51  ;;  %v1654_v59 = vmul.f32 %v1711_v31, %v1646_v51 }
 0x309   :  { %v1675_v32 = vsel %vm1655_vm10, %v1674_v36, 0.0  ;;  %v1656_v6 = vsel %vm1655_vm10, %v1654_v59, 0.0 }
 0x30a   :  { %1676 = vadd.xlane.f32.xlu0 %v1675_v32  ;;  %1657 = vadd.xlane.f32.xlu1 %v1656_v6 }
 0x393   :  { %v1677_v29 = vpop.xlane.xlu0 %1676  ;;  %v1658_v28 = vpop.xlane.xlu1 %1657 }
 0x394   :  { %v1685_v30 = vadd.f32 %v1714_v56, %v1677_v29  ;;  %v1666_v38 = vadd.f32 %v1712_v27, %v1658_v28 }
 0x396   :  { %v1687_v8 = vmul.f32 1.442695, %v1685_v30  ;;  %1700 = vst.msk [vmem:[%s3636_s8] sm:$0xf] %vm1699_vm11, %v1666_v38  ;;  %vm1686_vm13 = vcmp.gt.f32.partialorder %v1685_v30, 20.0 }
 0x398   :  { %1869 = vpow2.f32 %v1687_v8 }
 0x3a5   :  { %v1870_v10 = vpop.eup %1869 }
 0x3a6   :  { %v1689_v20 = vadd.f32 1.0, %v1870_v10  ;;  %v1692_v50 = vmul.f32 -0.5, %v1870_v10  ;;  %v1695_v47 = vand.u32 2147483647, %v1870_v10 }
 0x3a8   :  { %1871 = vlog2.f32 %v1689_v20  ;;  %v1693_v9 = vadd.f32 1.0, %v1692_v50  ;;  %vm1696_vm12 = vcmp.lt.f32.partialorder %v1695_v47, 0.0004427343 }
 0x3aa   :  { %v1694_v49 = vmul.f32 %v1870_v10, %v1693_v9 }
 0x3b5   :  { %v1872_v35 = vpop.eup %1871 }
 0x3b6   :  { %v1691_v25 = vmul.f32 0.6931472, %v1872_v35 }
 0x3b8   :  { %v1697_v1 = vsel %vm1696_vm12, %v1694_v49, %v1691_v25 }
 0x3b9   :  { %v1698_v14 = vsel %vm1686_vm13, %v1685_v30, %v1697_v1 }
 0x3ba   :  { %1701 = vst.msk [vmem:[%s3637_s9] sm:$0xf] %vm1699_vm11, %v1698_v14 }
 0x3bb   :  { %1710 = vsyncpa [#allocation7], 1 }

</bundles_post_ra>
